<compile_context>
chip_gen: v6e
topology: v6e:2x2x1
jax: 0.10.0
libtpu: 0.0.40
codegen_flags: <defaults>
</compile_context>

<pallas_src>
import functools
import math

import jax
import jax.numpy as jnp
from jax.experimental import pallas as pl
from jax.experimental.pallas import tpu as pltpu


def lrlc_kernel(x_ref, w_ref, cw_ref, b_ref, o_ref, *,
                rank, out_c, kernel_size, stride, lh, lw):
    """One batch element per grid step.

    x_ref : (1, C1, Hp, Wp)        padded input, compute dtype (bf16), Wp on lanes
    w_ref : (Kh, Kw, R*C2, C1)     per-tap conv bases, bf16 (resident)
    cw_ref: (1, R, Lh*Lw)          combining weights, f32, lane-dense
    b_ref : (C2, Lh*Lw)            broadcasted bias, f32 (resident, lane-dense)
    o_ref : (1, C2, Lh*Lw)         lane-dense output slab (NCHW order after reshape)
    """
    kh_sz, kw_sz = kernel_size
    sh, sw = stride
    n_pix = lh * lw

    x = x_ref[0]                     # (C1, Hp, Wp) bf16
    c1 = x.shape[0]
    w = w_ref[...]                   # (Kh, Kw, R*C2, C1) bf16

    # Per-tap MXU accumulation in transposed layout: no im2col concat, rank is
    # fused into the matmul M dimension (R*C2), pixels sit on the lane axis.
    acc = jnp.zeros((rank * out_c, n_pix), jnp.float32)
    for kh in range(kh_sz):
        for kw in range(kw_sz):
            tap = x[:, kh: kh + (lh - 1) * sh + 1: sh,
                       kw: kw + (lw - 1) * sw + 1: sw]     # (C1, Lh, Lw) bf16
            tap = tap.reshape(c1, n_pix)                   # lane-dense (C1, n_pix)
            acc = acc + jnp.dot(w[kh, kw], tap,
                                preferred_element_type=jnp.float32)

    # Rank combine + bias, all f32, all lane-dense.  Bias seeds the accumulator.
    cw = cw_ref[0]                   # (R, n_pix) f32
    out = b_ref[...]                 # (C2, n_pix) f32
    for r in range(rank):            # static, small
        out = out + acc[r * out_c:(r + 1) * out_c, :] * cw[r:r + 1, :]

    o_ref[0] = out.astype(o_ref.dtype)


def lrlc_forward(x, combining_weights, weight_bases, bias_c, bias_h, bias_w,
                 *, rank, out_c, kernel_size=(3, 3), stride=(1, 1),
                 padding=(1, 1), compute_dtype=jnp.bfloat16):
    """x: (N, C1, H, W) NCHW; combining_weights: (N, R, Lh, Lw).
    Returns (N, C2, Lh, Lw) NCHW, matching the PyTorch module."""
    N, C1, H, W = x.shape
    kh_sz, kw_sz = kernel_size
    sh, sw = stride
    ph, pw = padding
    Lh = (H + 2 * ph - (kh_sz - 1) - 1) // sh + 1
    Lw = (W + 2 * pw - (kw_sz - 1) - 1) // sw + 1
    Lhw = Lh * Lw
    Hp, Wp = H + 2 * ph, W + 2 * pw

    # --- layout plumbing (cheap, ~input bytes) ------------------------------
    # Padded input stays NCHW so Wp (not C1) is the lane axis inside the kernel.
    xp = jnp.pad(x, ((0, 0), (0, 0), (ph, ph), (pw, pw))).astype(compute_dtype)

    # weight_bases: (C2*R, C1, Kh, Kw); leading dim ordered (R, C2) per the
    # .view(R, out_c, ...) convention of the PyTorch module.  Present per-tap
    # slabs (R*C2, C1) so rank fuses into the matmul M dimension.
    w = weight_bases.reshape(rank, out_c, C1, kh_sz, kw_sz)
    w = jnp.transpose(w, (3, 4, 0, 1, 2)).reshape(kh_sz, kw_sz, rank * out_c, C1)
    w = w.astype(compute_dtype)

    # Combining weights lane-dense: (N, R, Lhw), pixels on lanes (no (Lhw,1)
    # trailing-1 lane padding).
    cw = combining_weights.reshape(N, rank, Lhw).astype(jnp.float32)

    # Bias already in the (C2, Lhw) layout of the accumulator / output.
    bias2d = (bias_c + bias_h + bias_w).reshape(out_c, Lhw).astype(jnp.float32)

    kern = functools.partial(
        lrlc_kernel, rank=rank, out_c=out_c, kernel_size=(kh_sz, kw_sz),
        stride=(sh, sw), lh=Lh, lw=Lw)

    out = pl.pallas_call(
        kern,
        out_shape=jax.ShapeDtypeStruct((N, out_c, Lhw), x.dtype),
        grid_spec=pltpu.PrefetchScalarGridSpec(
            num_scalar_prefetch=0,
            grid=(N,),
            in_specs=[
                pl.BlockSpec((1, C1, Hp, Wp), lambda n: (n, 0, 0, 0)),      # padded x
                pl.BlockSpec((kh_sz, kw_sz, rank * out_c, C1),
                             lambda n: (0, 0, 0, 0)),                        # weights (resident)
                pl.BlockSpec((1, rank, Lhw), lambda n: (n, 0, 0)),           # combining w.
                pl.BlockSpec((out_c, Lhw), lambda n: (0, 0)),                # bias (resident)
            ],
            out_specs=pl.BlockSpec((1, out_c, Lhw), lambda n: (n, 0, 0)),
        ),
        compiler_params=pltpu.CompilerParams(
            dimension_semantics=("parallel",),
            # Conservative scoped-VMEM request: safe on v7x (64 MiB physical);
            # can be raised on v5e/v6e (128 MiB) for larger images.
            vmem_limit_bytes=32 * 1024 * 1024),
    )(xp, w, cw, bias2d)

    # Output is already channel-major per batch element -> plain reshape = NCHW.
    return out.reshape(N, out_c, Lh, Lw)


def reference_forward(x, combining_weights, weight_bases, bias_c, bias_h, bias_w,
                      *, rank, out_c, stride, padding,
                      compute_dtype=jnp.bfloat16):
    """Pure-JAX reference mirroring the PyTorch forward, evaluated at the same
    operand precision (bf16-rounded x / weight_bases, f32 accumulation)."""
    xr = x.astype(compute_dtype).astype(jnp.float32)
    wr = weight_bases.astype(compute_dtype).astype(jnp.float32)
    convs = jax.lax.conv_general_dilated(
        xr, wr, window_strides=stride,
        padding=[(padding[0], padding[0]), (padding[1], padding[1])],
        dimension_numbers=("NCHW", "OIHW", "NCHW"),
        precision=jax.lax.Precision.HIGHEST)
    N = x.shape[0]
    Lh, Lw = convs.shape[2], convs.shape[3]
    convs = convs.reshape(N, rank, out_c, Lh, Lw)
    out = jnp.einsum("ijklm,ijlm->iklm", convs, combining_weights,
                     precision=jax.lax.Precision.HIGHEST)
    return out + (bias_c + bias_h + bias_w)[None]


if __name__ == "__main__":
    # Small, module-consistent shapes.
    N, C1, H, W = 2, 4, 16, 16
    C2, R = 8, 2
    Kh = Kw = 3
    stride = (1, 1)
    padding = (1, 1)
    Lh = (H + 2 * padding[0] - (Kh - 1) - 1) // stride[0] + 1
    Lw = (W + 2 * padding[1] - (Kw - 1) - 1) // stride[1] + 1

    key = jax.random.PRNGKey(0)
    k1, k2, k3, k4, k5, k6 = jax.random.split(key, 6)

    x = jax.random.normal(k1, (N, C1, H, W), dtype=jnp.float32)
    combining_weights = jax.random.normal(k2, (N, R, Lh, Lw), dtype=jnp.float32)

    # weight_bases: (C2*R, C1, Kh, Kw); kaiming_normal_(mode='fan_out', relu):
    # std = sqrt(2 / fan_out), fan_out = (C2*R) * Kh * Kw
    fan_out = (C2 * R) * Kh * Kw
    std = math.sqrt(2.0 / fan_out)
    weight_bases = std * jax.random.normal(k3, (C2 * R, C1, Kh, Kw), dtype=jnp.float32)

    # Biases are zero-init in the module; use small random values here so the
    # broadcast-add path is actually exercised (semantics unchanged).
    bias_c = 0.1 * jax.random.normal(k4, (C2, 1, 1), dtype=jnp.float32)
    bias_h = 0.1 * jax.random.normal(k5, (1, Lh, 1), dtype=jnp.float32)
    bias_w = 0.1 * jax.random.normal(k6, (1, 1, Lw), dtype=jnp.float32)

    fwd = jax.jit(functools.partial(
        lrlc_forward, rank=R, out_c=C2, kernel_size=(Kh, Kw),
        stride=stride, padding=padding))
    out = fwd(x, combining_weights, weight_bases, bias_c, bias_h, bias_w)
    out = jax.block_until_ready(out)

    ref = reference_forward(x, combining_weights, weight_bases,
                            bias_c, bias_h, bias_w,
                            rank=R, out_c=C2, stride=stride, padding=padding)
    ref = jax.block_until_ready(ref)

    assert out.shape == (N, C2, Lh, Lw), out.shape
    assert jnp.allclose(out, ref, rtol=1e-3, atol=1e-3), \
        float(jnp.max(jnp.abs(out - ref)))
    print("KERNEL_OK")
</pallas_src>

<mosaic_0001>
module attributes {stable_mosaic.version = 11 : i64} {
  func.func @lrlc_kernel(%arg0: i32, %arg1: memref<1x4x18x18xbf16, #tpu.memory_space<vmem>>, %arg2: memref<3x3x16x4xbf16, #tpu.memory_space<vmem>>, %arg3: memref<1x2x256xf32, #tpu.memory_space<vmem>>, %arg4: memref<8x256xf32, #tpu.memory_space<vmem>>, %arg5: memref<1x8x256xf32, #tpu.memory_space<vmem>>) attributes {dimension_semantics = [#tpu.dimension_semantics<parallel>], iteration_bounds = array<i64: 2>, scalar_prefetch = 0 : i64, scratch_operands = 0 : i64, tpu.core_type = #tpu.core_type<tc>, window_params = [{transform_indices = @transform_0, window_bounds = array<i64: 1, 4, 18, 18>}, {pipeline_mode = #tpu.pipeline_mode<synchronous>, transform_indices = @transform_1, window_bounds = array<i64: 3, 3, 16, 4>}, {transform_indices = @transform_2, window_bounds = array<i64: 1, 2, 256>}, {pipeline_mode = #tpu.pipeline_mode<synchronous>, transform_indices = @transform_3, window_bounds = array<i64: 8, 256>}, {transform_indices = @transform_4, window_bounds = array<i64: 1, 8, 256>}]} {
    %c0 = arith.constant 0 : index
    %c0_0 = arith.constant 0 : index
    %c0_1 = arith.constant 0 : index
    %c0_2 = arith.constant 0 : index
    %0 = vector.load %arg1[%c0, %c0_0, %c0_1, %c0_2] : memref<1x4x18x18xbf16, #tpu.memory_space<vmem>>, vector<1x4x18x18xbf16>
    %1 = vector.shape_cast %0 : vector<1x4x18x18xbf16> to vector<4x18x18xbf16>
    %c0_3 = arith.constant 0 : index
    %c0_4 = arith.constant 0 : index
    %c0_5 = arith.constant 0 : index
    %c0_6 = arith.constant 0 : index
    %2 = vector.load %arg2[%c0_3, %c0_4, %c0_5, %c0_6] : memref<3x3x16x4xbf16, #tpu.memory_space<vmem>>, vector<3x3x16x4xbf16>
    %cst = arith.constant 0.000000e+00 : f32
    %3 = vector.broadcast %cst : f32 to vector<16x256xf32>
    %4 = vector.extract_strided_slice %1 {offsets = [0, 0, 0], sizes = [4, 16, 16], strides = [1, 1, 1]} : vector<4x18x18xbf16> to vector<4x16x16xbf16>
    %5 = vector.shape_cast %4 : vector<4x16x16xbf16> to vector<4x256xbf16>
    %6 = vector.extract_strided_slice %2 {offsets = [0, 0, 0, 0], sizes = [1, 1, 16, 4], strides = [1, 1, 1, 1]} : vector<3x3x16x4xbf16> to vector<1x1x16x4xbf16>
    %7 = vector.shape_cast %6 : vector<1x1x16x4xbf16> to vector<16x4xbf16>
    %cst_7 = arith.constant dense<0.000000e+00> : vector<16x256xf32>
    %8 = tpu.matmul %7, %5, %cst_7 {dimension_numbers = #tpu.dot_dimension_numbers<[1], [0], [0], [1], [0, 0, 1, 1], [], []>} : vector<16x4xbf16>, vector<4x256xbf16>, vector<16x256xf32> -> vector<16x256xf32>
    %9 = arith.addf %3, %8 : vector<16x256xf32>
    %10 = vector.extract_strided_slice %1 {offsets = [0, 0, 1], sizes = [4, 16, 16], strides = [1, 1, 1]} : vector<4x18x18xbf16> to vector<4x16x16xbf16>
    %11 = vector.shape_cast %10 : vector<4x16x16xbf16> to vector<4x256xbf16>
    %12 = vector.extract_strided_slice %2 {offsets = [0, 1, 0, 0], sizes = [1, 1, 16, 4], strides = [1, 1, 1, 1]} : vector<3x3x16x4xbf16> to vector<1x1x16x4xbf16>
    %13 = vector.shape_cast %12 : vector<1x1x16x4xbf16> to vector<16x4xbf16>
    %cst_8 = arith.constant dense<0.000000e+00> : vector<16x256xf32>
    %14 = tpu.matmul %13, %11, %cst_8 {dimension_numbers = #tpu.dot_dimension_numbers<[1], [0], [0], [1], [0, 0, 1, 1], [], []>} : vector<16x4xbf16>, vector<4x256xbf16>, vector<16x256xf32> -> vector<16x256xf32>
    %15 = arith.addf %9, %14 : vector<16x256xf32>
    %16 = vector.extract_strided_slice %1 {offsets = [0, 0, 2], sizes = [4, 16, 16], strides = [1, 1, 1]} : vector<4x18x18xbf16> to vector<4x16x16xbf16>
    %17 = vector.shape_cast %16 : vector<4x16x16xbf16> to vector<4x256xbf16>
    %18 = vector.extract_strided_slice %2 {offsets = [0, 2, 0, 0], sizes = [1, 1, 16, 4], strides = [1, 1, 1, 1]} : vector<3x3x16x4xbf16> to vector<1x1x16x4xbf16>
    %19 = vector.shape_cast %18 : vector<1x1x16x4xbf16> to vector<16x4xbf16>
    %cst_9 = arith.constant dense<0.000000e+00> : vector<16x256xf32>
    %20 = tpu.matmul %19, %17, %cst_9 {dimension_numbers = #tpu.dot_dimension_numbers<[1], [0], [0], [1], [0, 0, 1, 1], [], []>} : vector<16x4xbf16>, vector<4x256xbf16>, vector<16x256xf32> -> vector<16x256xf32>
    %21 = arith.addf %15, %20 : vector<16x256xf32>
    %22 = vector.extract_strided_slice %1 {offsets = [0, 1, 0], sizes = [4, 16, 16], strides = [1, 1, 1]} : vector<4x18x18xbf16> to vector<4x16x16xbf16>
    %23 = vector.shape_cast %22 : vector<4x16x16xbf16> to vector<4x256xbf16>
    %24 = vector.extract_strided_slice %2 {offsets = [1, 0, 0, 0], sizes = [1, 1, 16, 4], strides = [1, 1, 1, 1]} : vector<3x3x16x4xbf16> to vector<1x1x16x4xbf16>
    %25 = vector.shape_cast %24 : vector<1x1x16x4xbf16> to vector<16x4xbf16>
    %cst_10 = arith.constant dense<0.000000e+00> : vector<16x256xf32>
    %26 = tpu.matmul %25, %23, %cst_10 {dimension_numbers = #tpu.dot_dimension_numbers<[1], [0], [0], [1], [0, 0, 1, 1], [], []>} : vector<16x4xbf16>, vector<4x256xbf16>, vector<16x256xf32> -> vector<16x256xf32>
    %27 = arith.addf %21, %26 : vector<16x256xf32>
    %28 = vector.extract_strided_slice %1 {offsets = [0, 1, 1], sizes = [4, 16, 16], strides = [1, 1, 1]} : vector<4x18x18xbf16> to vector<4x16x16xbf16>
    %29 = vector.shape_cast %28 : vector<4x16x16xbf16> to vector<4x256xbf16>
    %30 = vector.extract_strided_slice %2 {offsets = [1, 1, 0, 0], sizes = [1, 1, 16, 4], strides = [1, 1, 1, 1]} : vector<3x3x16x4xbf16> to vector<1x1x16x4xbf16>
    %31 = vector.shape_cast %30 : vector<1x1x16x4xbf16> to vector<16x4xbf16>
    %cst_11 = arith.constant dense<0.000000e+00> : vector<16x256xf32>
    %32 = tpu.matmul %31, %29, %cst_11 {dimension_numbers = #tpu.dot_dimension_numbers<[1], [0], [0], [1], [0, 0, 1, 1], [], []>} : vector<16x4xbf16>, vector<4x256xbf16>, vector<16x256xf32> -> vector<16x256xf32>
    %33 = arith.addf %27, %32 : vector<16x256xf32>
    %34 = vector.extract_strided_slice %1 {offsets = [0, 1, 2], sizes = [4, 16, 16], strides = [1, 1, 1]} : vector<4x18x18xbf16> to vector<4x16x16xbf16>
    %35 = vector.shape_cast %34 : vector<4x16x16xbf16> to vector<4x256xbf16>
    %36 = vector.extract_strided_slice %2 {offsets = [1, 2, 0, 0], sizes = [1, 1, 16, 4], strides = [1, 1, 1, 1]} : vector<3x3x16x4xbf16> to vector<1x1x16x4xbf16>
    %37 = vector.shape_cast %36 : vector<1x1x16x4xbf16> to vector<16x4xbf16>
    %cst_12 = arith.constant dense<0.000000e+00> : vector<16x256xf32>
    %38 = tpu.matmul %37, %35, %cst_12 {dimension_numbers = #tpu.dot_dimension_numbers<[1], [0], [0], [1], [0, 0, 1, 1], [], []>} : vector<16x4xbf16>, vector<4x256xbf16>, vector<16x256xf32> -> vector<16x256xf32>
    %39 = arith.addf %33, %38 : vector<16x256xf32>
    %40 = vector.extract_strided_slice %1 {offsets = [0, 2, 0], sizes = [4, 16, 16], strides = [1, 1, 1]} : vector<4x18x18xbf16> to vector<4x16x16xbf16>
    %41 = vector.shape_cast %40 : vector<4x16x16xbf16> to vector<4x256xbf16>
    %42 = vector.extract_strided_slice %2 {offsets = [2, 0, 0, 0], sizes = [1, 1, 16, 4], strides = [1, 1, 1, 1]} : vector<3x3x16x4xbf16> to vector<1x1x16x4xbf16>
    %43 = vector.shape_cast %42 : vector<1x1x16x4xbf16> to vector<16x4xbf16>
    %cst_13 = arith.constant dense<0.000000e+00> : vector<16x256xf32>
    %44 = tpu.matmul %43, %41, %cst_13 {dimension_numbers = #tpu.dot_dimension_numbers<[1], [0], [0], [1], [0, 0, 1, 1], [], []>} : vector<16x4xbf16>, vector<4x256xbf16>, vector<16x256xf32> -> vector<16x256xf32>
    %45 = arith.addf %39, %44 : vector<16x256xf32>
    %46 = vector.extract_strided_slice %1 {offsets = [0, 2, 1], sizes = [4, 16, 16], strides = [1, 1, 1]} : vector<4x18x18xbf16> to vector<4x16x16xbf16>
    %47 = vector.shape_cast %46 : vector<4x16x16xbf16> to vector<4x256xbf16>
    %48 = vector.extract_strided_slice %2 {offsets = [2, 1, 0, 0], sizes = [1, 1, 16, 4], strides = [1, 1, 1, 1]} : vector<3x3x16x4xbf16> to vector<1x1x16x4xbf16>
    %49 = vector.shape_cast %48 : vector<1x1x16x4xbf16> to vector<16x4xbf16>
    %cst_14 = arith.constant dense<0.000000e+00> : vector<16x256xf32>
    %50 = tpu.matmul %49, %47, %cst_14 {dimension_numbers = #tpu.dot_dimension_numbers<[1], [0], [0], [1], [0, 0, 1, 1], [], []>} : vector<16x4xbf16>, vector<4x256xbf16>, vector<16x256xf32> -> vector<16x256xf32>
    %51 = arith.addf %45, %50 : vector<16x256xf32>
    %52 = vector.extract_strided_slice %1 {offsets = [0, 2, 2], sizes = [4, 16, 16], strides = [1, 1, 1]} : vector<4x18x18xbf16> to vector<4x16x16xbf16>
    %53 = vector.shape_cast %52 : vector<4x16x16xbf16> to vector<4x256xbf16>
    %54 = vector.extract_strided_slice %2 {offsets = [2, 2, 0, 0], sizes = [1, 1, 16, 4], strides = [1, 1, 1, 1]} : vector<3x3x16x4xbf16> to vector<1x1x16x4xbf16>
    %55 = vector.shape_cast %54 : vector<1x1x16x4xbf16> to vector<16x4xbf16>
    %cst_15 = arith.constant dense<0.000000e+00> : vector<16x256xf32>
    %56 = tpu.matmul %55, %53, %cst_15 {dimension_numbers = #tpu.dot_dimension_numbers<[1], [0], [0], [1], [0, 0, 1, 1], [], []>} : vector<16x4xbf16>, vector<4x256xbf16>, vector<16x256xf32> -> vector<16x256xf32>
    %57 = arith.addf %51, %56 : vector<16x256xf32>
    %c0_16 = arith.constant 0 : index
    %c0_17 = arith.constant 0 : index
    %c0_18 = arith.constant 0 : index
    %58 = vector.load %arg3[%c0_16, %c0_17, %c0_18] : memref<1x2x256xf32, #tpu.memory_space<vmem>>, vector<1x2x256xf32>
    %59 = vector.shape_cast %58 : vector<1x2x256xf32> to vector<2x256xf32>
    %c0_19 = arith.constant 0 : index
    %c0_20 = arith.constant 0 : index
    %60 = vector.load %arg4[%c0_19, %c0_20] : memref<8x256xf32, #tpu.memory_space<vmem>>, vector<8x256xf32>
    %61 = vector.extract_strided_slice %57 {offsets = [0, 0], sizes = [8, 256], strides = [1, 1]} : vector<16x256xf32> to vector<8x256xf32>
    %62 = vector.extract_strided_slice %59 {offsets = [0, 0], sizes = [1, 256], strides = [1, 1]} : vector<2x256xf32> to vector<1x256xf32>
    %63 = vector.broadcast %62 : vector<1x256xf32> to vector<8x256xf32>
    %64 = arith.mulf %61, %63 : vector<8x256xf32>
    %65 = arith.addf %60, %64 : vector<8x256xf32>
    %66 = vector.extract_strided_slice %57 {offsets = [8, 0], sizes = [8, 256], strides = [1, 1]} : vector<16x256xf32> to vector<8x256xf32>
    %67 = vector.extract_strided_slice %59 {offsets = [1, 0], sizes = [1, 256], strides = [1, 1]} : vector<2x256xf32> to vector<1x256xf32>
    %68 = vector.broadcast %67 : vector<1x256xf32> to vector<8x256xf32>
    %69 = arith.mulf %66, %68 : vector<8x256xf32>
    %70 = arith.addf %65, %69 : vector<8x256xf32>
    %c0_21 = arith.constant 0 : index
    %c0_22 = arith.constant 0 : index
    %c0_23 = arith.constant 0 : index
    %71 = vector.load %arg5[%c0_21, %c0_22, %c0_23] : memref<1x8x256xf32, #tpu.memory_space<vmem>>, vector<1x8x256xf32>
    %72 = vector.shape_cast %71 : vector<1x8x256xf32> to vector<8x256xf32>
    %73 = vector.shape_cast %70 : vector<8x256xf32> to vector<1x8x256xf32>
    tpu.vector_store %arg5[%c0_21, %c0_22, %c0_23], %73 {strides = array<i32>} : memref<1x8x256xf32, #tpu.memory_space<vmem>>, vector<1x8x256xf32>,
    return
  }
  func.func @transform_0(%arg0: i32) -> (i32, i32, i32, i32) {
    %c0_i32 = arith.constant 0 : i32
    %c0_i32_0 = arith.constant 0 : i32
    %c0_i32_1 = arith.constant 0 : i32
    %c0_i32_2 = arith.constant 0 : i32
    return %arg0, %c0_i32, %c0_i32_0, %c0_i32_1 : i32, i32, i32, i32
  }
  func.func @transform_1(%arg0: i32) -> (i32, i32, i32, i32) {
    %c0_i32 = arith.constant 0 : i32
    %c0_i32_0 = arith.constant 0 : i32
    %c0_i32_1 = arith.constant 0 : i32
    %c0_i32_2 = arith.constant 0 : i32
    %c0_i32_3 = arith.constant 0 : i32
    return %c0_i32, %c0_i32_0, %c0_i32_1, %c0_i32_2 : i32, i32, i32, i32
  }
  func.func @transform_2(%arg0: i32) -> (i32, i32, i32) {
    %c0_i32 = arith.constant 0 : i32
    %c0_i32_0 = arith.constant 0 : i32
    %c0_i32_1 = arith.constant 0 : i32
    return %arg0, %c0_i32, %c0_i32_0 : i32, i32, i32
  }
  func.func @transform_3(%arg0: i32) -> (i32, i32) {
    %c0_i32 = arith.constant 0 : i32
    %c0_i32_0 = arith.constant 0 : i32
    %c0_i32_1 = arith.constant 0 : i32
    return %c0_i32, %c0_i32_0 : i32, i32
  }
  func.func @transform_4(%arg0: i32) -> (i32, i32, i32) {
    %c0_i32 = arith.constant 0 : i32
    %c0_i32_0 = arith.constant 0 : i32
    %c0_i32_1 = arith.constant 0 : i32
    return %arg0, %c0_i32, %c0_i32_0 : i32, i32, i32
  }
}

</mosaic_0001>

<bundles_post_ra>
// kernel: lrlc_forward.1
= control target key start
LH: loop header
LB: loop body
LE: loop exit
PB: predicated region body
PF: predicated region fallthrough
CT: control target
= control target key end

     0   :  { %s3778_s15 = smov 0   ;;  %s5305_s0 = inlined_call_operand.vmem [shape: bf16[2,4,18,18], index: 0, kind: input, shape index: {}]   ;;  %s5306_s1 = inlined_call_operand.vmem [shape: bf16[3,3,16,4], index: 1, kind: input, shape index: {}]   ;;  %s5307_s2 = inlined_call_operand.vmem [shape: f32[2,2,256], index: 2, kind: input, shape index: {}]   ;;  %s5308_s3 = inlined_call_operand.vmem [shape: f32[8,256], index: 3, kind: input, shape index: {}]   ;;  %s5309_s4 = inlined_call_operand.vmem [shape: f32[2,8,256], index: 4, kind: output, shape index: {}]  }
   0x1 LB: > { %s3460_s16 = sadd.s32 4294967295, %s3739_s15   ;;  %p3464_p0 = scmp.ge.s32.totalorder %s3739_s15, 1  ;;  %s3739_s15 = sphi %s3778_s15, %s14_s15  }
   0x2   : > { %p172_p1 = scmp.lt.s32.totalorder %s3739_s15, 3 }
   0x4   : > { %p173_p2 = pnand %p3464_p0, %p172_p1 }
   0x6   : > { %176 = sbr.rel (%p173_p2) target bundleno = 718 (0x2ce), region = 36 }
   0xb   : > { %p203_p3 = scmp.lt.s32.totalorder %s3460_s16, 1  ;;  %s3741_s21 = smov 127   ;;  %vm1247_vm0 = vsmask.f32 3328  ;;  %vm1248_vm1 = vsmask.f32 7440  ;;  %v277_v40 = vlaneseq }
   0xc   : > { %vm3859_vm2 = vmor %vm1247_vm0, %vm1248_vm1  ;;  %vm2323_vm3 = vcmask 1042432   ;;  %vm2324_vm4 = vcmask 1046532   ;;  %s3742_s22 = smov 126   ;;  %s3745_s23 = smov 16   ;;  %vm479_vm6 = vcmask 130048   ;;  %vm483_vm7 = vcmask 261120  }
   0xd   : > { %s5387_s16 = smov (!%p203_p3, %s3460_s16), 1  ;;  %vm3930_vm5 = vmor %vm2323_vm3, %vm2324_vm4  ;;  %s3746_s24 = smov 32   ;;  %vm486_vm8 = vcmask 392192   ;;  %vm489_vm9 = vcmask 523264   ;;  %vm492_vm10 = vcmask 654336   ;;  %vm495_vm11 = vcmask 785408  }
   0xe   : > { %s3703_s17 = smul.u32 48, %s5387_s16  ;;  %s3747_s25 = smov 48   ;;  %vm498_vm12 = vcmask 916480   ;;  %vm809_vm13 = vcmask 1041408   ;;  %vm805_vm14 = vcmask 31744  }
   0xf   : > { %s3748_s26 = smov 64   ;;  %s3749_s27 = smov 96  }
  0x10   : > { %s3792_s20 = scalar_lea.vmem %s5305_s0, %s3703_s17  ;;  %s3750_s28 = smov 80  }
  0x11   : > { %v3795_v0 = vld [vmem:[%s3792_s20 + $0xc] sm:$0xf]  ;;  %v3798_v1 = vld [vmem:[%s3792_s20] sm:$0xf]  ;;  %v3805_v2 = vld [vmem:[%s3792_s20 + $0x10] sm:$0xf] }
  0x12   : > { %528 = vrot.lane.b32.xlu1 %v3795_v0, %s3741_s21  ;;  %524 = vrot.lane.b32.xlu0 %v3798_v1, %s3741_s21  ;;  %v3808_v3 = vld [vmem:[%s3792_s20 + $0x4] sm:$0xf]  ;;  %v252_v4 = vshrl.u32 %v3798_v1, 16  ;;  %v1252_v5 = vshll.u32 %v3798_v1, 16  ;;  %v251_v6 = vpack.i.b16 %v3795_v0, %v3798_v1  ;;  %v3817_v8 = vld [vmem:[%s3792_s20 + $0x8] sm:$0x1] }
  0x13   : > { %v263_v7 = vpack.i.b16 %v3805_v2, %v3808_v3  ;;  %v264_v9 = vshrl.u32 %v3808_v3, 16  ;;  %v1257_v10 = vshll.u32 %v3808_v3, 16  ;;  %v3824_v13 = vld [vmem:[%s3792_s20 + $0x1c] sm:$0xf]  ;;  %v1266_v14 = vshll.u32 %v3817_v8, 16  ;;  %s3751_s29 = smov 112  }
  0x14   : > { %v1251_v11 = vrot.slane %v252_v4, 4  ;;  %v1254_v12 = vrot.slane %v1252_v5, 5  ;;  %v3828_v15 = vld [vmem:[%s3792_s20 + $0x14] sm:$0x1]  ;;  %v265_v16 = vshrl.u32 %v3805_v2, 16  ;;  %v1277_v17 = vshll.u32 %v3805_v2, 16 }
  0x15   : > { %v253_v18 = vshrl.u32 %v3795_v0, 16  ;;  %v3838_v19 = vld [vmem:[%s3792_s20 + $0x18] sm:$0xf]  ;;  %v1259_v20 = vrot.slane %v1257_v10, 5  ;;  %v1262_v21 = vrot.slane %v264_v9, 4  ;;  %v1286_v23 = vshll.u32 %v3828_v15, 16 }
  0x16   : > { %530 = vrot.lane.b32.xlu1 %v3805_v2, %s3741_s21  ;;  %526 = vrot.lane.b32.xlu0 %v3808_v3, %s3741_s21  ;;  %v1255_v22 = vor.u32 %v1254_v12, %v1251_v11  ;;  %v1268_v24 = vrot.slane %v1266_v14, 5  ;;  %v1279_v25 = vrot.slane %v1277_v17, 5  ;;  %v1282_v26 = vrot.slane %v265_v16, 4  ;;  %v3846_v27 = vld [vmem:[%s3792_s20 + $0x20] sm:$0x1]  ;;  %s3630_s30 = sshll.u32 %s5387_s16, 4 }
  0x17   : > { %v1263_v28 = vor.u32 %v1262_v21, %v1259_v20  ;;  %v1271_v30 = vrot.slane %v253_v18, 4  ;;  %v1272_v31 = vshll.u32 %v3795_v0, 16  ;;  %v3852_v32 = vld [vmem:[%s3792_s20 + $0x28] sm:$0xf]  ;;  %v3855_v33 = vld [vmem:[%s3792_s20 + $0x24] sm:$0xf]  ;;  %s217_s9 = scalar_lea.vmem %s5309_s4, %s3630_s30 }
  0x18   : > { %v1256_v29 = vrot.slane %v1255_v22, 4  ;;  %v1283_v35 = vor.u32 %v1282_v26, %v1279_v25  ;;  %v1288_v36 = vrot.slane %v1286_v23, 5  ;;  %v270_v37 = vshrl.u32 %v3824_v13, 16  ;;  %v3871_v43 = vld [vmem:[%s3792_s20 + $0x2c] sm:$0x1] }
  0x19   : > { %v1297_v38 = vshll.u32 %v3824_v13, 16  ;;  %v1264_v39 = vrot.slane %v1263_v28, 4  ;;  %v1274_v41 = vrot.slane %v1272_v31, 5  ;;  %v258_v42 = vshrl.u32 %v3838_v19, 16 }
  0x1a   : > { %534 = vrot.lane.b32.xlu1 %v3824_v13, %s3741_s21  ;;  %532 = vrot.lane.b32.xlu0 %v3838_v19, %s3741_s21  ;;  %v1284_v44 = vrot.slane %v1283_v35, 4  ;;  %v1302_v46 = vrot.slane %v270_v37, 4  ;;  %v1306_v47 = vshll.u32 %v3846_v27, 16  ;;  %v3882_v49 = vsel %vm3859_vm2, %v1256_v29, %v1259_v20 }
  0x1b   : > { %v1299_v45 = vrot.slane %v1297_v38, 5  ;;  %v3878_v48 = vsel %vm3859_vm2, %v1264_v39, %v1268_v24  ;;  %v1275_v50 = vor.u32 %v1274_v41, %v1271_v30  ;;  %v1291_v51 = vrot.slane %v258_v42, 4 }
  0x1c   : > { %v1345_v52 = vshrl.u32 %v3878_v48, 16  ;;  %v3889_v53 = vsel %vm3859_vm2, %v1284_v44, %v1288_v36  ;;  %v1292_v55 = vshll.u32 %v3838_v19, 16  ;;  %v271_v59 = vshrl.u32 %v3852_v32, 16 }
  0x1d   : > { %v1303_v54 = vor.u32 %v1302_v46, %v1299_v45  ;;  %v1346_v56 = vshrl.u32 %v3889_v53, 16  ;;  %v1344_v57 = vpack.i.b16 %v3889_v53, %v3878_v48  ;;  %v1276_v58 = vrot.slane %v1275_v50, 4 }
  0x1e   : > { %538 = vrot.lane.b32.xlu1 %v3852_v32, %s3741_s21  ;;  %536 = vrot.lane.b32.xlu0 %v3855_v33, %s3741_s21  ;;  %v1333_v60 = vshrl.u32 %v3882_v49, 16  ;;  %v1294_v61 = vrot.slane %v1292_v55, 5  ;;  %v1317_v62 = vshll.u32 %v3852_v32, 16  ;;  %v1326_v63 = vshll.u32 %v3871_v43, 16 }
  0x1f   : > { %v3903_v5 = vpack.i.b16 %v1346_v56, %v1345_v52  ;;  %v3907_v10 = vsel %vm3859_vm2, %v1276_v58, %v1279_v25  ;;  %v1322_v11 = vrot.slane %v271_v59, 4  ;;  %v1304_v20 = vrot.slane %v1303_v54, 4 }
  0x20   : > { %v1334_v12 = vshrl.u32 %v3907_v10, 16  ;;  %v1332_v14 = vpack.i.b16 %v3907_v10, %v3882_v49  ;;  %v1295_v17 = vor.u32 %v1294_v61, %v1291_v51  ;;  %v1308_v21 = vrot.slane %v1306_v47, 5 }
  0x21   : > { %v1319_v22 = vrot.slane %v1317_v62, 5  ;;  %v259_v23 = vshrl.u32 %v3855_v33, 16  ;;  %v1328_v26 = vrot.slane %v1326_v63, 5  ;;  %v1312_v28 = vshll.u32 %v3855_v33, 16 }
  0x22   : > { %914 = vrot.lane.b32.xlu1 %v3808_v3, %s3742_s22  ;;  %912 = vrot.lane.b32.xlu0 %v3798_v1, %s3742_s22  ;;  %v3919_v24 = vpack.i.b16 %v1334_v12, %v1333_v60  ;;  %v1296_v25 = vrot.slane %v1295_v17, 4  ;;  %v2328_v31 = vrot.slane %v3808_v3, 5  ;;  %v2331_v35 = vrot.slane %v3817_v8, 5 }
  0x23   : > { %v1323_v29 = vor.u32 %v1322_v11, %v1319_v22  ;;  %v1311_v30 = vrot.slane %v259_v23, 4  ;;  %v3743_v36 = vmov 1983009808   ;;  %v1314_v39 = vrot.slane %v1312_v28, 5 }
  0x24   : > { %v3926_v38 = vunpack.c.l.s4 %v3743_v36  ;;  %v3572_v44 = vrot.slane %v3798_v1, 9  ;;  %v2335_v46 = vrot.slane %v3805_v2, 5  ;;  %v3942_v8 = vsel %vm3859_vm2, %v1304_v20, %v1308_v21 }
  0x25   : > { %v1324_v47 = vrot.slane %v1323_v29, 4  ;;  %v2330_v50 = vrot.slane %v2328_v31, 4  ;;  %v2338_v51 = vrot.slane %v3828_v15, 5  ;;  %v1351_v52 = vshrl.u32 %v3942_v8, 16 }
  0x26   : > { %918 = vrot.lane.b32.xlu1 %v3805_v2, %s3742_s22  ;;  %916 = vrot.lane.b32.xlu0 %v3795_v0, %s3742_s22  ;;  %v1315_v54 = vor.u32 %v1314_v39, %v1311_v30  ;;  %v2337_v55 = vrot.slane %v2335_v46, 4  ;;  %v3573_v56 = vrot.slane %v3795_v0, 9  ;;  %v3949_v58 = vsel %vm3859_vm2, %v1296_v25, %v1299_v45 }
  0x27   : > { %v3953_v60 = vsel %vm3859_vm2, %v1324_v47, %v1328_v26  ;;  %v3957_v61 = vsel %vm3930_vm5, %v2330_v50, %v2331_v35  ;;  %v3961_v15 = vsel %vm3930_vm5, %v3572_v44, %v2328_v31  ;;  %v2342_v45 = vrot.slane %v3824_v13, 5 }
  0x28   : > { %v1350_v62 = vpack.i.b16 %v3953_v60, %v3942_v8  ;;  %v1352_v63 = vshrl.u32 %v3953_v60, 16  ;;  %v1316_v11 = vrot.slane %v1315_v54, 4  ;;  %v1339_v12 = vshrl.u32 %v3949_v58, 16 }
  0x29   : > { %v2369_v17 = vshrl.u32 %v3957_v61, 16  ;;  %v2357_v20 = vshrl.u32 %v3961_v15, 16  ;;  %v3976_v21 = vsel %vm3930_vm5, %v2337_v55, %v2338_v51  ;;  %v3988_v29 = vsel %vm3930_vm5, %v3573_v56, %v2335_v46 }
  0x2a   : > { %922 = vrot.lane.b32.xlu1 %v3824_v13, %s3742_s22  ;;  %920 = vrot.lane.b32.xlu0 %v3838_v19, %s3742_s22  ;;  %v3978_v25 = vpack.i.b16 %v1352_v63, %v1351_v52  ;;  %v3982_v26 = vsel %vm3859_vm2, %v1316_v11, %v1319_v22  ;;  %v2370_v35 = vshrl.u32 %v3976_v21, 16  ;;  %v2358_v34 = vshrl.u32 %v3988_v29, 16 }
  0x2b   : > { %v1338_v30 = vpack.i.b16 %v3982_v26, %v3949_v58  ;;  %v1340_v31 = vshrl.u32 %v3982_v26, 16  ;;  %v2344_v22 = vrot.slane %v2342_v45, 4  ;;  %v2345_v39 = vrot.slane %v3846_v27, 5 }
  0x2c   : > { %v3574_v44 = vrot.slane %v3838_v19, 9  ;;  %v4005_v47 = vpack.i.b16 %v2370_v35, %v2369_v17  ;;  %v4007_v50 = vpack.i.b16 %v2358_v34, %v2357_v20  ;;  %v2349_v51 = vrot.slane %v3852_v32, 5 }
  0x2d   : > { %v4003_v46 = vpack.i.b16 %v1340_v31, %v1339_v12  ;;  %v4011_v52 = vshrl.u32 %v277_v40, 7  ;;  %v2352_v54 = vrot.slane %v3871_v43, 5  ;;  %v3575_v55 = vrot.slane %v3855_v33, 9 }
  0x2e   : > { %926 = vrot.lane.b32.xlu1 %v3852_v32, %s3742_s22  ;;  %924 = vrot.lane.b32.xlu0 %v3855_v33, %s3742_s22  ;;  %v4015_v27 = vsel %vm3930_vm5, %v3574_v44, %v2342_v45  ;;  %v276_v56 = vunpack.c.0.s8 %v3926_v38  ;;  %v4022_v63 = vsel %vm3930_vm5, %v2344_v22, %v2345_v39  ;;  %v2351_v12 = vrot.slane %v2349_v51, 4 }
  0x2f   : > { %5333 = vst [vmem:[#allocation2_spill] sm:$0xff] %v4011_v52  ;;  %v2363_v11 = vshrl.u32 %v4015_v27, 16  ;;  %v2375_v40 = vshrl.u32 %v4022_v63, 16  ;;  %v4032_v43 = vsel %vm3930_vm5, %v3575_v55, %v2349_v51  ;;  %v269_v41 = vpack.i.b16 %v3852_v32, %v3824_v13 }
  0x30   : > { %v4036_v38 = vsel %vm3930_vm5, %v2351_v12, %v2352_v54  ;;  %v2364_v17 = vshrl.u32 %v4032_v43, 16  ;;  %v4045_v35 = vsub.s32 %v276_v56, %v4011_v52  ;;  %v257_v51 = vpack.i.b16 %v3855_v33, %v3838_v19 }
  0x31   : > { %v2376_v31 = vshrl.u32 %v4036_v38, 16  ;;  %v254_v2 = vpack.i.b16 %v253_v18, %v252_v4  ;;  %v260_v1 = vpack.i.b16 %v259_v23, %v258_v42  ;;  %v3744_v18 = vmov 1934713408  }
  0x32   : > { %1651 = vrot.lane.b32.xlu1 %v3878_v48, %s3741_s21  ;;  %1649 = vrot.lane.b32.xlu0 %v3882_v49, %s3741_s21  ;;  %v4047_v34 = vpack.i.b16 %v2364_v17, %v2363_v11  ;;  %v4061_v39 = vrot.slane %v263_v7, %v4045_v35  ;;  %v4064_v44 = vrot.slane %v269_v41, %v4045_v35  ;;  %v292_v19 = vunpack.c.l.s4 %v3744_v18 }
  0x33   : > { %v4055_v22 = vpack.i.b16 %v2376_v31, %v2375_v40  ;;  %v4072_v54 = vrot.slane %v251_v6, %v4045_v35  ;;  %v266_v7 = vpack.i.b16 %v265_v16, %v264_v9  ;;  %v272_v6 = vpack.i.b16 %v271_v59, %v270_v37 }
  0x34   : > { %v357_v55 = vcombine.low %v4061_v39, %v4064_v44  ;;  %v4091_v11 = vrot.slane %v257_v51, %v4045_v35  ;;  %v4122_v4 = vrot.slane %v254_v2, %v4045_v35  ;;  %v4125_v13 = vrot.slane %v260_v1, %v4045_v35 }
  0x35   : > { %v4106_v3 = vrot.slane %v266_v7, %v4045_v35  ;;  %v4109_v9 = vrot.slane %v272_v6, %v4045_v35  ;;  %v4161_v32 = vrot.slane %v1344_v57, %v4045_v35  ;;  %v4167_v33 = vrot.slane %v1350_v62, %v4045_v35 }
  0x36   : > { %1655 = vrot.lane.b32.xlu1 %v3889_v53, %s3741_s21  ;;  %1653 = vrot.lane.b32.xlu0 %v3907_v10, %s3741_s21  ;;  %v289_v12 = vcombine.low %v4072_v54, %v4091_v11  ;;  %v4171_v37 = vrot.slane %v3903_v5, %v4045_v35  ;;  %v4175_v42 = vrot.slane %v3978_v25, %v4045_v35  ;;  %v293_v59 = vunpack.c.0.s8 %v292_v19 }
  0x37   : > { %v4193_v57 = vrot.slane %v1338_v30, %v4045_v35  ;;  %v4197_v5 = vrot.slane %v3919_v24, %v4045_v35  ;;  %v4201_v23 = vrot.slane %v4003_v46, %v4045_v35 }
  0x39   : > { %5335 = vst [vmem:[#allocation4_spill] sm:$0xff] %v4193_v57 }
  0x3a   : > { %1659 = vrot.lane.b32.xlu1 %v3942_v8, %s3741_s21  ;;  %1657 = vrot.lane.b32.xlu0 %v3949_v58, %s3741_s21 }
  0x3e   : > { %1663 = vrot.lane.b32.xlu1 %v3953_v60, %s3741_s21  ;;  %1661 = vrot.lane.b32.xlu0 %v3982_v26, %s3741_s21 }
  0x42   : > { %1986 = vrot.lane.b32.xlu1 %v3878_v48, %s3742_s22  ;;  %1984 = vrot.lane.b32.xlu0 %v3882_v49, %s3742_s22  ;;  %v4206_v49 = vsub.s32 %v293_v59, %v4011_v52 }
  0x44   : > { %v4234_v30 = vrot.slane %v357_v55, %v4206_v49  ;;  %v4237_v46 = vrot.slane %v289_v12, %v4206_v49 }
  0x46   : > { %1990 = vrot.lane.b32.xlu1 %v3889_v53, %s3742_s22  ;;  %1988 = vrot.lane.b32.xlu0 %v3907_v10, %s3742_s22  ;;  %v4187_v53 = vrot.slane %v1332_v14, %v4045_v35  ;;  %v391_v10 = vcombine.low %v4106_v3, %v4109_v9  ;;  %v323_v14 = vcombine.low %v4122_v4, %v4125_v13 }
  0x47   : > { %5336 = vst [vmem:[#allocation5_spill] sm:$0xff] %v4234_v30  ;;  %5337 = vst [vmem:[#allocation6_spill] sm:$0xff] %v4237_v46  ;;  %v3635_v31 = vcombine.high %v4234_v30, %v4234_v30  ;;  %v3631_v41 = vcombine.high %v4237_v46, %v4237_v46 }
  0x48   : > { %5334 = vst [vmem:[#allocation3_spill] sm:$0xff] %v4187_v53  ;;  %v331_v62 = vrot.slane %v323_v14, %v4206_v49 }
  0x4a   : > { %1994 = vrot.lane.b32.xlu1 %v3942_v8, %s3742_s22  ;;  %1992 = vrot.lane.b32.xlu0 %v3949_v58, %s3742_s22  ;;  %v3632_v7 = vcombine.high %v331_v62, %v331_v62 }
  0x4e   : > { %1998 = vrot.lane.b32.xlu1 %v3953_v60, %s3742_s22  ;;  %1996 = vrot.lane.b32.xlu0 %v3982_v26, %s3742_s22  ;;  %v399_v60 = vrot.slane %v391_v10, %v4206_v49  ;;  %v3470_v26 = vcombine.low %v331_v62, %v331_v62 }
  0x50   : > { %v3477_v25 = vcombine.low %v399_v60, %v399_v60  ;;  %v3636_v55 = vcombine.high %v399_v60, %v399_v60 }
  0x52   : > { %2675 = vrot.lane.b32.xlu1 %v3957_v61, %s3741_s21  ;;  %2673 = vrot.lane.b32.xlu0 %v3961_v15, %s3741_s21 }
  0x56   : > { %2679 = vrot.lane.b32.xlu1 %v3976_v21, %s3741_s21  ;;  %2677 = vrot.lane.b32.xlu0 %v3988_v29, %s3741_s21 }
  0x5a   : > { %2683 = vrot.lane.b32.xlu1 %v4022_v63, %s3741_s21  ;;  %2681 = vrot.lane.b32.xlu0 %v4015_v27, %s3741_s21 }
  0x5e   : > { %2687 = vrot.lane.b32.xlu1 %v4036_v38, %s3741_s21  ;;  %2685 = vrot.lane.b32.xlu0 %v4032_v43, %s3741_s21 }
  0x62   : > { %3010 = vrot.lane.b32.xlu1 %v3957_v61, %s3742_s22  ;;  %3008 = vrot.lane.b32.xlu0 %v3961_v15, %s3742_s22 }
  0x66   : > { %3014 = vrot.lane.b32.xlu1 %v3976_v21, %s3742_s22  ;;  %3012 = vrot.lane.b32.xlu0 %v3988_v29, %s3742_s22 }
  0x6a   : > { %3018 = vrot.lane.b32.xlu1 %v4022_v63, %s3742_s22  ;;  %3016 = vrot.lane.b32.xlu0 %v4015_v27, %s3742_s22 }
  0x6e   : > { %3022 = vrot.lane.b32.xlu1 %v4036_v38, %s3742_s22  ;;  %3020 = vrot.lane.b32.xlu0 %v4032_v43, %s3742_s22 }
  0x72   : > { %447 = vrot.lane.b32.xlu1 %v3477_v25, %s3745_s23  ;;  %412 = vrot.lane.b32.xlu0 %v3470_v26, %s3745_s23 }
  0x76   : > { %452 = vrot.lane.b32.xlu1 %v3635_v31, %s3746_s24  ;;  %417 = vrot.lane.b32.xlu0 %v3631_v41, %s3746_s24 }
  0x7a   : > { %457 = vrot.lane.b32.xlu1 %v3636_v55, %s3747_s25  ;;  %422 = vrot.lane.b32.xlu0 %v3632_v7, %s3747_s25 }
  0x84   : > { %v529_v2 = vpop.permute.xlu1 %528  ;;  %v525_v1 = vpop.permute.xlu0 %524 }
  0x85   : > { %v542_v14 = vpack.i.b16 %v529_v2, %v525_v1  ;;  %v544_v48 = vshrl.u32 %v529_v2, 16  ;;  %v543_v45 = vshrl.u32 %v525_v1, 16 }
  0x87   : > { %v571_v55 = vrot.slane %v542_v14, %v4045_v35 }
  0x88   : > { %v531_v18 = vpop.permute.xlu1 %530  ;;  %v527_v19 = vpop.permute.xlu0 %526 }
  0x89   : > { %v554_v60 = vpack.i.b16 %v531_v18, %v527_v19  ;;  %v556_v7 = vshrl.u32 %v531_v18, 16  ;;  %v555_v51 = vshrl.u32 %v527_v19, 16 }
  0x8b   : > { %v639_v12 = vrot.slane %v554_v60, %v4045_v35  ;;  %v557_v40 = vpack.i.b16 %v556_v7, %v555_v51  ;;  %v545_v60 = vpack.i.b16 %v544_v48, %v543_v45 }
  0x8c   : > { %v535_v59 = vpop.permute.xlu1 %534  ;;  %v533_v10 = vpop.permute.xlu0 %532 }
  0x8d   : > { %v561_v17 = vshrl.u32 %v535_v59, 16  ;;  %v549_v58 = vshrl.u32 %v533_v10, 16  ;;  %v673_v45 = vrot.slane %v557_v40, %v4045_v35  ;;  %v605_v48 = vrot.slane %v545_v60, %v4045_v35 }
  0x90   : > { %v539_v62 = vpop.permute.xlu1 %538  ;;  %v537_v25 = vpop.permute.xlu0 %536 }
  0x91   : > { %v560_v26 = vpack.i.b16 %v539_v62, %v535_v59  ;;  %v562_v31 = vshrl.u32 %v539_v62, 16  ;;  %v548_v41 = vpack.i.b16 %v537_v25, %v533_v10  ;;  %v550_v6 = vshrl.u32 %v537_v25, 16 }
  0x93   : > { %v647_v8 = vrot.slane %v560_v26, %v4045_v35  ;;  %v579_v24 = vrot.slane %v548_v41, %v4045_v35  ;;  %v563_v62 = vpack.i.b16 %v562_v31, %v561_v17  ;;  %v551_v0 = vpack.i.b16 %v550_v6, %v549_v58 }
  0x94   : > { %v4261_v36 = vpop.permute.xlu1 %914  ;;  %v4263_v16 = vpop.permute.xlu0 %912 }
  0x95   : > { %v648_v25 = vcombine.low %v639_v12, %v647_v8  ;;  %v580_v14 = vcombine.low %v571_v55, %v579_v24  ;;  %v649_v18 = vcombine.high %v639_v12, %v647_v8  ;;  %v581_v19 = vcombine.high %v571_v55, %v579_v24 }
  0x96   : > { %v681_v26 = vrot.slane %v563_v62, %v4045_v35  ;;  %v613_v17 = vrot.slane %v551_v0, %v4045_v35 }
  0x97   : > { %v4266_v59 = vrot.slane %v648_v25, %v4206_v49  ;;  %v4269_v10 = vrot.slane %v580_v14, %v4206_v49  ;;  %v663_v58 = vrot.slane %v649_v18, %v4206_v49  ;;  %v595_v51 = vrot.slane %v581_v19, %v4206_v49 }
  0x98   : > { %v4271_v2 = vpop.permute.xlu1 %918  ;;  %v4273_v1 = vpop.permute.xlu0 %916  ;;  %v682_v12 = vcombine.low %v673_v45, %v681_v26  ;;  %v614_v55 = vcombine.low %v605_v48, %v613_v17  ;;  %v615_v28 = vcombine.high %v605_v48, %v613_v17  ;;  %v4341_v48 = vrot.slane %v4047_v34, %v4045_v35 }
  0x99   : > { %5338 = vst [vmem:[#allocation7_spill] sm:$0xff] %v4266_v59  ;;  %5339 = vst [vmem:[#allocation8_spill] sm:$0xff] %v4269_v10  ;;  %v3643_v8 = vcombine.high %v4266_v59, %v4266_v59  ;;  %v3639_v24 = vcombine.high %v4269_v10, %v4269_v10  ;;  %v3494_v31 = vcombine.low %v663_v58, %v663_v58  ;;  %v944_v56 = vshrl.u32 %v4271_v2, 16 }
  0x9a   : > { %v3487_v41 = vcombine.low %v595_v51, %v595_v51  ;;  %v3645_v25 = vcombine.high %v663_v58, %v663_v58  ;;  %v3641_v14 = vcombine.high %v595_v51, %v595_v51  ;;  %v690_v18 = vrot.slane %v682_v12, %v4206_v49 }
  0x9b   : > { %743 = vrot.lane.b32.xlu1 %v3643_v8, %s3746_s24  ;;  %708 = vrot.lane.b32.xlu0 %v3639_v24, %s3746_s24  ;;  %v622_v24 = vrot.slane %v614_v55, %v4206_v49  ;;  %v932_v20 = vshrl.u32 %v4273_v1, 16  ;;  %v683_v12 = vcombine.high %v673_v45, %v681_v26 }
  0x9c   : > { %v4287_v6 = vpop.permute.xlu1 %922  ;;  %v4289_v0 = vpop.permute.xlu0 %920  ;;  %v3491_v46 = vcombine.low %v690_v18, %v690_v18 }
  0x9d   : > { %v949_v62 = vshrl.u32 %v4287_v6, 16  ;;  %v937_v19 = vshrl.u32 %v4289_v0, 16  ;;  %v3484_v30 = vcombine.low %v622_v24, %v622_v24  ;;  %v697_v53 = vrot.slane %v683_v12, %v4206_v49 }
  0x9e   : > { %v3640_v45 = vcombine.high %v622_v24, %v622_v24 }
  0x9f   : > { %753 = vrot.lane.b32.xlu1 %v3494_v31, %s3748_s26  ;;  %718 = vrot.lane.b32.xlu0 %v3487_v41, %s3748_s26  ;;  %v943_v31 = vshrl.u32 %v4261_v36, 16  ;;  %v931_v41 = vshrl.u32 %v4263_v16, 16 }
  0xa0   : > { %v4293_v40 = vpop.permute.xlu1 %926  ;;  %v4295_v7 = vpop.permute.xlu0 %924 }
  0xa1   : > { %v950_v60 = vshrl.u32 %v4293_v40, 16  ;;  %v938_v8 = vshrl.u32 %v4295_v7, 16  ;;  %v945_v10 = vpack.i.b16 %v944_v56, %v943_v31  ;;  %v933_v59 = vpack.i.b16 %v932_v20, %v931_v41 }
  0xa2   : > { %v629_v20 = vrot.slane %v615_v28, %v4206_v49  ;;  %v4329_v56 = vrot.slane %v4005_v47, %v4045_v35  ;;  %v5342_v41 = vcombine.high %v4061_v39, %v4064_v44 }
  0xa3   : > { %763 = vrot.lane.b32.xlu1 %v3645_v25, %s3749_s27  ;;  %728 = vrot.lane.b32.xlu0 %v3641_v14, %s3749_s27  ;;  %v951_v55 = vpack.i.b16 %v950_v60, %v949_v62  ;;  %v939_v52 = vpack.i.b16 %v938_v8, %v937_v19  ;;  %v3644_v14 = vcombine.high %v690_v18, %v690_v18 }
  0xa4   : > { %v4309_v58 = vpop.permute.xlu1 %1651  ;;  %v4311_v51 = vpop.permute.xlu0 %1649  ;;  %v4347_v28 = vrot.slane %v933_v59, %v4045_v35  ;;  %v948_v62 = vpack.i.b16 %v4293_v40, %v4287_v6  ;;  %v3495_v18 = vcombine.low %v697_v53, %v697_v53  ;;  %v936_v19 = vpack.i.b16 %v4295_v7, %v4289_v0 }
  0xa5   : > { %v4321_v26 = vrot.slane %v951_v55, %v4045_v35  ;;  %v4324_v17 = vrot.slane %v939_v52, %v4045_v35  ;;  %v4344_v52 = vrot.slane %v945_v10, %v4045_v35  ;;  %v5341_v10 = vpack.i.b16 %v4036_v38, %v4022_v63 }
  0xa6   : > { %v3488_v60 = vcombine.low %v629_v20, %v629_v20  ;;  %v942_v63 = vpack.i.b16 %v4271_v2, %v4261_v36  ;;  %v930_v38 = vpack.i.b16 %v4273_v1, %v4263_v16  ;;  %v1035_v0 = vrot.slane %v948_v62, %v4045_v35 }
  0xa7   : > { %738 = vrot.lane.b32.xlu1 %v3491_v46, %s3745_s23  ;;  %703 = vrot.lane.b32.xlu0 %v3484_v30, %s3745_s23  ;;  %v4333_v30 = vrot.slane %v4007_v50, %v4045_v35  ;;  %v4337_v46 = vrot.slane %v4055_v22, %v4045_v35  ;;  %v5340_v22 = vpack.i.b16 %v3976_v21, %v3957_v61 }
  0xa8   : > { %v4315_v57 = vpop.permute.xlu1 %1655  ;;  %v4317_v25 = vpop.permute.xlu0 %1653  ;;  %v4365_v59 = vrot.slane %v5341_v10, %v4045_v35  ;;  %v1070_v8 = vcombine.low %v4344_v52, %v4321_v26  ;;  %v1002_v61 = vcombine.low %v4347_v28, %v4324_v17  ;;  %v3646_v40 = vcombine.high %v697_v53, %v697_v53 }
  0xa9   : > { %v4359_v34 = vrot.slane %v5340_v22, %v4045_v35  ;;  %v3642_v7 = vcombine.high %v629_v20, %v629_v20  ;;  %v967_v24 = vrot.slane %v936_v19, %v4045_v35  ;;  %v372_v12 = vrot.slane %v5342_v41, %v4206_v49 }
  0xaa   : > { %v1078_v31 = vrot.slane %v1070_v8, %v4206_v49  ;;  %v1010_v36 = vrot.slane %v1002_v61, %v4206_v49  ;;  %v1027_v53 = vrot.slane %v942_v63, %v4045_v35  ;;  %v959_v55 = vrot.slane %v930_v38, %v4045_v35 }
  0xab   : > { %748 = vrot.lane.b32.xlu1 %v3644_v14, %s3747_s25  ;;  %713 = vrot.lane.b32.xlu0 %v3640_v45, %s3747_s25  ;;  %v5343_v14 = vcombine.high %v4072_v54, %v4091_v11  ;;  %v3480_v39 = vcombine.low %v372_v12, %v372_v12  ;;  %v5346_v11 = vcombine.high %v4106_v3, %v4109_v9 }
  0xac   : > { %v4351_v47 = vpop.permute.xlu1 %1659  ;;  %v4353_v50 = vpop.permute.xlu0 %1657  ;;  %v1036_v20 = vcombine.low %v1027_v53, %v1035_v0  ;;  %v968_v22 = vcombine.low %v959_v55, %v967_v24  ;;  %v3511_v10 = vcombine.low %v1078_v31, %v1078_v31  ;;  %v3504_v62 = vcombine.low %v1010_v36, %v1010_v36 }
  0xad   : > { %v304_v45 = vrot.slane %v5343_v14, %v4206_v49  ;;  %v406_v8 = vrot.slane %v5346_v11, %v4206_v49  ;;  %v5347_v61 = vcombine.high %v4122_v4, %v4125_v13  ;;  %v5348_v3 = vpack.i.b16 %v3988_v29, %v3961_v15 }
  0xae   : > { %v4417_v54 = vrot.slane %v968_v22, %v4206_v49  ;;  %v5349_v4 = vpack.i.b16 %v4032_v43, %v4015_v27  ;;  %v1037_v27 = vcombine.high %v1027_v53, %v1035_v0  ;;  %v969_v43 = vcombine.high %v959_v55, %v967_v24 }
  0xaf   : > { %758 = vrot.lane.b32.xlu1 %v3495_v18, %s3750_s28  ;;  %723 = vrot.lane.b32.xlu0 %v3488_v60, %s3750_s28  ;;  %v3473_v44 = vcombine.low %v304_v45, %v304_v45  ;;  %v4414_v60 = vrot.slane %v1036_v20, %v4206_v49  ;;  %v338_v63 = vrot.slane %v5347_v61, %v4206_v49 }
  0xb0   : > { %v4389_v2 = vpop.permute.xlu1 %1663  ;;  %v4391_v16 = vpop.permute.xlu0 %1661  ;;  %5345 = vst [vmem:[#allocation10_spill] sm:$0xff] %v4417_v54  ;;  %v4441_v9 = vrot.slane %v5348_v3, %v4045_v35  ;;  %v4447_v13 = vrot.slane %v5349_v4, %v4045_v35  ;;  %v3481_v14 = vcombine.low %v406_v8, %v406_v8  ;;  %v1051_v11 = vrot.slane %v1037_v27, %v4206_v49 }
  0xb1   : > { %5344 = vst [vmem:[#allocation9_spill] sm:$0xff] %v4414_v60  ;;  %v3651_v38 = vcombine.high %v4414_v60, %v4414_v60  ;;  %v3474_v20 = vcombine.low %v338_v63, %v338_v63  ;;  %v983_v61 = vrot.slane %v969_v43, %v4206_v49  ;;  %v3638_v53 = vcombine.high %v406_v8, %v406_v8 }
  0xb2   : > { %v3514_v0 = vcombine.low %v1051_v11, %v1051_v11  ;;  %v3634_v55 = vcombine.high %v338_v63, %v338_v63  ;;  %v1668_v27 = vshrl.u32 %v4311_v51, 16  ;;  %v1681_v43 = vshrl.u32 %v4315_v57, 16 }
  0xb3   : > { %768 = vrot.lane.b32.xlu1 %v3646_v40, %s3751_s29  ;;  %733 = vrot.lane.b32.xlu0 %v3642_v7, %s3751_s29  ;;  %v3647_v40 = vcombine.high %v4417_v54, %v4417_v54  ;;  %v3507_v24 = vcombine.low %v983_v61, %v983_v61 }
  0xb4   : > { %v4409_v18 = vpop.permute.xlu1 %1986  ;;  %v4411_v19 = vpop.permute.xlu0 %1984 }
  0xb7   : > { %1126 = vrot.lane.b32.xlu1 %v3511_v10, %s3745_s23  ;;  %1091 = vrot.lane.b32.xlu0 %v3504_v62, %s3745_s23  ;;  %v3652_v10 = vcombine.high %v1078_v31, %v1078_v31  ;;  %v3648_v62 = vcombine.high %v1010_v36, %v1010_v36  ;;  %v1071_v31 = vcombine.high %v4344_v52, %v4321_v26  ;;  %v5320_v52 = vmov 0  }
  0xb8   : > { %v4433_v7 = vpop.permute.xlu1 %1990  ;;  %v4435_v41 = vpop.permute.xlu0 %1988  ;;  %v1003_v36 = vcombine.high %v4347_v28, %v4324_v17  ;;  %846 = vmatprep.mubr.bf16.mxu0 %v5320_v52  ;;  %901 = vmatprep.mubr.bf16.mxu1 %v5320_v52 }
  0xb9   : > { %v1085_v4 = vrot.slane %v1071_v31, %v4206_v49  ;;  %v1675_v31 = vshrl.u32 %v4391_v16, 16 }
  0xba   : > { %v1017_v26 = vrot.slane %v1003_v36, %v4206_v49  ;;  %v3649_v36 = vcombine.high %v983_v61, %v983_v61  ;;  %v5351_v61 = vcombine.low %v4197_v5, %v4201_v23 }
  0xbb   : > { %462 = vrot.lane.b32.xlu1 %v3480_v39, %s3748_s26  ;;  %427 = vrot.lane.b32.xlu0 %v3473_v44, %s3748_s26  ;;  %v3637_v39 = vcombine.high %v372_v12, %v372_v12  ;;  %v3633_v44 = vcombine.high %v304_v45, %v304_v45  ;;  %v3515_v28 = vcombine.low %v1085_v4, %v1085_v4 }
  0xbc   : > { %v4453_v22 = vpop.permute.xlu1 %1994  ;;  %v4455_v15 = vpop.permute.xlu0 %1992  ;;  %v3508_v8 = vcombine.low %v1017_v26, %v1017_v26  ;;  %v3654_v29 = vcombine.high %v1085_v4, %v1085_v4  ;;  %v3650_v1 = vcombine.high %v1017_v26, %v1017_v26 }
  0xbf   : > { %1131 = vrot.lane.b32.xlu1 %v3651_v38, %s3746_s24  ;;  %1096 = vrot.lane.b32.xlu0 %v3647_v40, %s3746_s24 }
  0xc0   : > { %v4463_v38 = vpop.permute.xlu1 %1998  ;;  %v4465_v40 = vpop.permute.xlu0 %1996 }
  0xc3   : > { %467 = vrot.lane.b32.xlu1 %v3481_v14, %s3750_s28  ;;  %432 = vrot.lane.b32.xlu0 %v3474_v20, %s3750_s28  ;;  %v1680_v20 = vshrl.u32 %v4309_v58, 16 }
  0xc4   : > { %v4477_v45 = vpop.permute.xlu1 %2675  ;;  %v4479_v3 = vpop.permute.xlu0 %2673 }
  0xc5   : > { %v1682_v17 = vpack.i.b16 %v1681_v43, %v1680_v20  ;;  %v5355_v20 = vld [vmem:[#allocation4_spill] sm:$0xff] }
  0xc7   : > { %1136 = vrot.lane.b32.xlu1 %v3652_v10, %s3747_s25  ;;  %1101 = vrot.lane.b32.xlu0 %v3648_v62, %s3747_s25  ;;  %v1669_v62 = vshrl.u32 %v4317_v25, 16  ;;  %v1412_v10 = vrot.slane %v5351_v61, %v4206_v49  ;;  %v5354_v61 = vld [vmem:[#allocation3_spill] sm:$0xff]  ;;  %v4536_v4 = vrot.slane %v1682_v17, %v4045_v35 }
  0xc8   : > { %v4488_v63 = vpop.permute.xlu1 %2679  ;;  %v4490_v14 = vpop.permute.xlu0 %2677 }
  0xcb   : > { %472 = vrot.lane.b32.xlu1 %v3637_v39, %s3749_s27  ;;  %437 = vrot.lane.b32.xlu0 %v3633_v44, %s3749_s27  ;;  %v1686_v39 = vshrl.u32 %v4351_v47, 16  ;;  %v1674_v44 = vshrl.u32 %v4353_v50, 16 }
  0xcd   : > { %v1676_v52 = vpack.i.b16 %v1675_v31, %v1674_v44  ;;  %v1673_v31 = vpack.i.b16 %v4391_v16, %v4353_v50 }
  0xcf   : > { %1141 = vrot.lane.b32.xlu1 %v3514_v0, %s3748_s26  ;;  %1106 = vrot.lane.b32.xlu0 %v3507_v24, %s3748_s26  ;;  %v3653_v0 = vcombine.high %v1051_v11, %v1051_v11  ;;  %v1687_v24 = vshrl.u32 %v4389_v2, 16  ;;  %v4515_v11 = vpop.permute.xlu0 %2681  ;;  %v4545_v26 = vrot.slane %v1676_v52, %v4045_v35  ;;  %v1667_v52 = vpack.i.b16 %v4317_v25, %v4311_v51 }
  0xd0   : > { %v1704_v50 = vrot.slane %v1673_v31, %v4045_v35 }
  0xd1   : > { %v1688_v12 = vpack.i.b16 %v1687_v24, %v1686_v39  ;;  %v1685_v24 = vpack.i.b16 %v4389_v2, %v4351_v47  ;;  %v1696_v25 = vrot.slane %v1667_v52, %v4045_v35 }
  0xd3   : > { %477 = vrot.lane.b32.xlu1 %v3638_v53, %s3751_s29  ;;  %442 = vrot.lane.b32.xlu0 %v3634_v55, %s3751_s29  ;;  %v5350_v55 = vcombine.low %v4171_v37, %v4175_v42  ;;  %v1670_v53 = vpack.i.b16 %v1669_v62, %v1668_v27  ;;  %v5356_v27 = vcombine.low %v5354_v61, %v5355_v20  ;;  %v4549_v39 = vpop.permute.xlu0 %2685 }
  0xd4   : > { %v1772_v47 = vrot.slane %v1685_v24, %v4045_v35 }
  0xd5   : > { %v4533_v43 = vrot.slane %v5356_v27, %v4206_v49  ;;  %v5359_v27 = vcombine.high %v5354_v61, %v5355_v20 }
  0xd7   : > { %1146 = vrot.lane.b32.xlu1 %v3515_v28, %s3750_s28  ;;  %1111 = vrot.lane.b32.xlu0 %v3508_v8, %s3750_s28  ;;  %v1480_v28 = vrot.slane %v5350_v55, %v4206_v49  ;;  %v4513_v8 = vpop.permute.xlu1 %2683  ;;  %5357 = vst [vmem:[#allocation3_spill] sm:$0xff] %v4533_v43  ;;  %v3655_v44 = vcombine.high %v4533_v43, %v4533_v43 }
  0xd9   : > { %v3528_v55 = vcombine.low %v1480_v28, %v1480_v28 }
  0xdb   : > { %1151 = vrot.lane.b32.xlu1 %v3653_v0, %s3749_s27  ;;  %1116 = vrot.lane.b32.xlu0 %v3649_v36, %s3749_s27  ;;  %v3521_v0 = vcombine.low %v1412_v10, %v1412_v10  ;;  %v5352_v36 = vcombine.low %v4161_v32, %v4167_v33  ;;  %v4547_v62 = vpop.permute.xlu1 %2687 }
  0xdd   : > { %v4527_v6 = vrot.slane %v5352_v36, %v4206_v49  ;;  %v4571_v36 = vpop.permute.xlu0 %3008 }
  0xdf   : > { %1156 = vrot.lane.b32.xlu1 %v3654_v29, %s3751_s29  ;;  %1121 = vrot.lane.b32.xlu0 %v3650_v1, %s3751_s29  ;;  %5353 = vst [vmem:[#allocation11_spill] sm:$0xff] %v4527_v6  ;;  %v4539_v29 = vrot.slane %v1670_v53, %v4045_v35  ;;  %v4542_v1 = vrot.slane %v1688_v12, %v4045_v35 }
  0xe0   : > { %v3659_v17 = vcombine.high %v4527_v6, %v4527_v6  ;;  %v1679_v12 = vpack.i.b16 %v4315_v57, %v4309_v58  ;;  %v3660_v57 = vcombine.high %v1480_v28, %v1480_v28  ;;  %v3656_v58 = vcombine.high %v1412_v10, %v1412_v10 }
  0xe1   : > { %v1807_v53 = vcombine.low %v4536_v4, %v4542_v1  ;;  %v5358_v10 = vcombine.high %v4161_v32, %v4167_v33  ;;  %v4593_v24 = vpop.permute.xlu0 %3012 }
  0xe2   : > { %v1764_v51 = vrot.slane %v1679_v12, %v4045_v35  ;;  %v1705_v12 = vcombine.low %v1696_v25, %v1704_v50 }
  0xe3   : > { %1528 = vrot.lane.b32.xlu1 %v3528_v55, %s3745_s23  ;;  %1493 = vrot.lane.b32.xlu0 %v3521_v0, %s3745_s23  ;;  %v1739_v55 = vcombine.low %v4539_v29, %v4545_v26  ;;  %v4569_v0 = vpop.permute.xlu1 %3010  ;;  %v1815_v2 = vrot.slane %v1807_v53, %v4206_v49  ;;  %v1453_v28 = vrot.slane %v5358_v10, %v4206_v49 }
  0xe4   : > { %v4601_v61 = vrot.slane %v1705_v12, %v4206_v49 }
  0xe5   : > { %v1747_v16 = vrot.slane %v1739_v55, %v4206_v49  ;;  %v3545_v31 = vcombine.low %v1815_v2, %v1815_v2  ;;  %v3531_v55 = vcombine.low %v1453_v28, %v1453_v28 }
  0xe6   : > { %5361 = vst [vmem:[#allocation12_spill] sm:$0xff] %v4601_v61 }
  0xe7   : > { %1533 = vrot.lane.b32.xlu1 %v3659_v17, %s3746_s24  ;;  %1498 = vrot.lane.b32.xlu0 %v3655_v44, %s3746_s24  ;;  %v1385_v17 = vrot.slane %v5359_v27, %v4206_v49  ;;  %v1773_v44 = vcombine.low %v1764_v51, %v1772_v47  ;;  %v4591_v52 = vpop.permute.xlu1 %3014  ;;  %v3538_v53 = vcombine.low %v1747_v16, %v1747_v16 }
  0xe8   : > { %v5363_v27 = vcombine.high %v4197_v5, %v4201_v23  ;;  %v1706_v5 = vcombine.high %v1696_v25, %v1704_v50  ;;  %v1740_v25 = vcombine.high %v4539_v29, %v4545_v26  ;;  %v2003_v50 = vshrl.u32 %v4411_v19, 16 }
  0xe9   : > { %v3524_v32 = vcombine.low %v1385_v17, %v1385_v17  ;;  %v4598_v33 = vrot.slane %v1773_v44, %v4206_v49  ;;  %v3657_v21 = vcombine.high %v1385_v17, %v1385_v17  ;;  %v2004_v17 = vshrl.u32 %v4435_v41, 16 }
  0xea   : > { %v1419_v44 = vrot.slane %v5363_v27, %v4206_v49  ;;  %v3668_v27 = vcombine.high %v1815_v2, %v1815_v2  ;;  %v2009_v29 = vshrl.u32 %v4455_v15, 16  ;;  %v2010_v26 = vshrl.u32 %v4465_v40, 16 }
  0xeb   : > { %1538 = vrot.lane.b32.xlu1 %v3660_v57, %s3747_s25  ;;  %1503 = vrot.lane.b32.xlu0 %v3656_v58, %s3747_s25  ;;  %5360 = vst [vmem:[#allocation4_spill] sm:$0xff] %v4598_v33  ;;  %v4603_v20 = vpop.permute.xlu1 %3018  ;;  %v4605_v57 = vpop.permute.xlu0 %3016  ;;  %v5362_v58 = vcombine.high %v4171_v37, %v4175_v42  ;;  %v3667_v12 = vcombine.high %v4598_v33, %v4598_v33 }
  0xec   : > { %v1774_v42 = vcombine.high %v1764_v51, %v1772_v47  ;;  %v1808_v51 = vcombine.high %v4536_v4, %v4542_v1  ;;  %v2015_v47 = vshrl.u32 %v4409_v18, 16  ;;  %v2021_v4 = vshrl.u32 %v4453_v22, 16 }
  0xed   : > { %v1487_v10 = vrot.slane %v5362_v58, %v4206_v49  ;;  %v2022_v1 = vshrl.u32 %v4463_v38, 16  ;;  %v2011_v43 = vpack.i.b16 %v2010_v26, %v2009_v29  ;;  %v1754_v60 = vrot.slane %v1740_v25, %v4206_v49 }
  0xef   : > { %1863 = vrot.lane.b32.xlu1 %v3545_v31, %s3745_s23  ;;  %1828 = vrot.lane.b32.xlu0 %v3538_v53, %s3745_s23  ;;  %v3663_v31 = vcombine.high %v4601_v61, %v4601_v61  ;;  %v3532_v53 = vcombine.low %v1487_v10, %v1487_v10  ;;  %v4625_v37 = vpop.permute.xlu0 %3020  ;;  %v1788_v61 = vrot.slane %v1774_v42, %v4206_v49 }
  0xf0   : > { %5364 = vst [vmem:[#allocation13_spill] sm:$0xff] %v4625_v37  ;;  %v2023_v33 = vpack.i.b16 %v2022_v1, %v2021_v4  ;;  %v2014_v37 = vpack.i.b16 %v4433_v7, %v4409_v18  ;;  %v2008_v18 = vpack.i.b16 %v4465_v40, %v4455_v15 }
  0xf3   : > { %1543 = vrot.lane.b32.xlu1 %v3531_v55, %s3748_s26  ;;  %1508 = vrot.lane.b32.xlu0 %v3524_v32, %s3748_s26  ;;  %v3525_v55 = vcombine.low %v1419_v44, %v1419_v44  ;;  %v4623_v32 = vpop.permute.xlu1 %3022  ;;  %v4631_v58 = vpop.permute.xlu0 %412 }
  0xf7   : > { %1868 = vrot.lane.b32.xlu1 %v3667_v12, %s3746_s24  ;;  %1833 = vrot.lane.b32.xlu0 %v3663_v31, %s3746_s24  ;;  %v4629_v23 = vpop.permute.xlu1 %447  ;;  %v3664_v12 = vcombine.high %v1747_v16, %v1747_v16  ;;  %v3661_v31 = vcombine.high %v1453_v28, %v1453_v28  ;;  %v4645_v16 = vpop.permute.xlu0 %417  ;;  %v2016_v28 = vshrl.u32 %v4433_v7, 16 }
  0xfb   : > { %1548 = vrot.lane.b32.xlu1 %v3532_v53, %s3750_s28  ;;  %1513 = vrot.lane.b32.xlu0 %v3525_v55, %s3750_s28  ;;  %v1720_v53 = vrot.slane %v1706_v5, %v4206_v49  ;;  %v4643_v2 = vpop.permute.xlu1 %452  ;;  %v3548_v55 = vcombine.low %v1788_v61, %v1788_v61  ;;  %v3662_v5 = vcombine.high %v1487_v10, %v1487_v10  ;;  %v4660_v54 = vpop.permute.xlu0 %422 }
  0xfd   : > { %v3541_v42 = vcombine.low %v1720_v53, %v1720_v53 }
  0xff   : > { %1873 = vrot.lane.b32.xlu1 %v3668_v27, %s3747_s25  ;;  %1838 = vrot.lane.b32.xlu0 %v3664_v12, %s3747_s25  ;;  %v2017_v27 = vpack.i.b16 %v2016_v28, %v2015_v47  ;;  %v2005_v12 = vpack.i.b16 %v2004_v17, %v2003_v50  ;;  %v4658_v6 = vpop.permute.xlu1 %457  ;;  %v4678_v47 = vrot.slane %v2023_v33, %v4045_v35 }
 0x100   : > { %v3542_v50 = vcombine.low %v1754_v60, %v1754_v60  ;;  %v4688_v28 = vrot.slane %v2014_v37, %v4045_v35  ;;  %v3665_v33 = vcombine.high %v1720_v53, %v1720_v53  ;;  %v3666_v53 = vcombine.high %v1754_v60, %v1754_v60 }
 0x101   : > { %v4670_v10 = vrot.slane %v2017_v27, %v4045_v35 }
 0x103   : > { %1553 = vrot.lane.b32.xlu1 %v3661_v31, %s3749_s27  ;;  %1518 = vrot.lane.b32.xlu0 %v3657_v21, %s3749_s27  ;;  %v3658_v21 = vcombine.high %v1419_v44, %v1419_v44  ;;  %v1822_v31 = vrot.slane %v1808_v51, %v4206_v49  ;;  %v4673_v44 = vrot.slane %v2005_v12, %v4045_v35 }
 0x104   : > { %v2020_v51 = vpack.i.b16 %v4463_v38, %v4453_v22  ;;  %v3669_v38 = vcombine.high %v1788_v61, %v1788_v61  ;;  %v2142_v40 = vcombine.low %v4670_v10, %v4678_v47 }
 0x105   : > { %v3549_v25 = vcombine.low %v1822_v31, %v1822_v31  ;;  %v3670_v61 = vcombine.high %v1822_v31, %v1822_v31 }
 0x106   : > { %v4694_v15 = vrot.slane %v2020_v51, %v4045_v35 }
 0x107   : > { %1878 = vrot.lane.b32.xlu1 %v3548_v55, %s3748_s26  ;;  %1843 = vrot.lane.b32.xlu0 %v3541_v42, %s3748_s26  ;;  %v2002_v55 = vpack.i.b16 %v4435_v41, %v4411_v19  ;;  %v4683_v19 = vrot.slane %v2011_v43, %v4045_v35  ;;  %v4699_v43 = vrot.slane %v2008_v18, %v4045_v35 }
 0x108   : > { %v2108_v29 = vcombine.low %v4688_v28, %v4694_v15 }
 0x109   : > { %v4691_v22 = vrot.slane %v2002_v55, %v4045_v35  ;;  %v2074_v17 = vcombine.low %v4673_v44, %v4683_v19 }
 0x10a   : > { %v4714_v55 = vrot.slane %v2108_v29, %v4206_v49 }
 0x10b   : > { %1558 = vrot.lane.b32.xlu1 %v3662_v5, %s3751_s29  ;;  %1523 = vrot.lane.b32.xlu0 %v3658_v21, %s3751_s29  ;;  %v2040_v1 = vcombine.low %v4691_v22, %v4699_v43  ;;  %v2150_v5 = vrot.slane %v2142_v40, %v4206_v49  ;;  %v2082_v21 = vrot.slane %v2074_v17, %v4206_v49 }
 0x10d   : > { %v744_v7 = vpop.permute.xlu1 %743  ;;  %v709_v41 = vpop.permute.xlu0 %708  ;;  %v3562_v60 = vcombine.low %v2150_v5, %v2150_v5  ;;  %v3555_v31 = vcombine.low %v2082_v21, %v2082_v21  ;;  %v4717_v51 = vrot.slane %v2040_v1, %v4206_v49 }
 0x10f   : > { %1883 = vrot.lane.b32.xlu1 %v3549_v25, %s3750_s28  ;;  %1848 = vrot.lane.b32.xlu0 %v3542_v50, %s3750_s28  ;;  %v5365_v25 = vld [vmem:[#allocation7_spill] sm:$0xff]  ;;  %v5366_v50 = vld [vmem:[#allocation8_spill] sm:$0xff]  ;;  %v3671_v29 = vcombine.high %v4717_v51, %v4717_v51 }
 0x111   : > { %v754_v4 = vpop.permute.xlu1 %753  ;;  %v719_v37 = vpop.permute.xlu0 %718 }
 0x113   : > { %1888 = vrot.lane.b32.xlu1 %v3669_v38, %s3749_s27  ;;  %1853 = vrot.lane.b32.xlu0 %v3665_v33, %s3749_s27 }
 0x115   : > { %v764_v26 = vpop.permute.xlu1 %763  ;;  %v729_v42 = vpop.permute.xlu0 %728 }
 0x117   : > { %1893 = vrot.lane.b32.xlu1 %v3670_v61, %s3751_s29  ;;  %1858 = vrot.lane.b32.xlu0 %v3666_v53, %s3751_s29  ;;  %v3675_v53 = vcombine.high %v4714_v55, %v4714_v55 }
 0x119   : > { %v739_v27 = vpop.permute.xlu1 %738  ;;  %v704_v12 = vpop.permute.xlu0 %703 }
 0x11a   : > { %v787_v18 = vsel %vm479_vm6, %v5365_v25, %v739_v27  ;;  %v772_v38 = vsel %vm479_vm6, %v5366_v50, %v704_v12  ;;  %v2109_v12 = vcombine.high %v4688_v28, %v4694_v15 }
 0x11b   : > { %2198 = vrot.lane.b32.xlu1 %v3562_v60, %s3745_s23  ;;  %2163 = vrot.lane.b32.xlu0 %v3555_v31, %s3745_s23  ;;  %v789_v33 = vsel %vm483_vm7, %v787_v18, %v744_v7  ;;  %v774_v17 = vsel %vm483_vm7, %v772_v38, %v709_v41  ;;  %v5367_v7 = vcombine.low %v4329_v56, %v4337_v46 }
 0x11c   : > { %v5368_v60 = vcombine.low %v4333_v30, %v4341_v48 }
 0x11d   : > { %v749_v40 = vpop.permute.xlu1 %748  ;;  %v714_v61 = vpop.permute.xlu0 %713  ;;  %v4739_v41 = vrot.slane %v5367_v7, %v4206_v49 }
 0x11e   : > { %v791_v1 = vsel %vm486_vm8, %v789_v33, %v749_v40  ;;  %v776_v27 = vsel %vm486_vm8, %v774_v17, %v714_v61  ;;  %v4747_v31 = vrot.slane %v5368_v60, %v4206_v49  ;;  %v3676_v33 = vcombine.high %v2150_v5, %v2150_v5 }
 0x11f   : > { %2203 = vrot.lane.b32.xlu1 %v3675_v53, %s3746_s24  ;;  %2168 = vrot.lane.b32.xlu0 %v3671_v29, %s3746_s24  ;;  %v793_v25 = vsel %vm489_vm9, %v791_v1, %v754_v4  ;;  %v778_v50 = vsel %vm489_vm9, %v776_v27, %v719_v37  ;;  %v3672_v40 = vcombine.high %v2082_v21, %v2082_v21 }
 0x120   : > { %v2041_v17 = vcombine.high %v4691_v22, %v4699_v43  ;;  %v3583_v15 = vcombine.low %v4739_v41, %v4739_v41  ;;  %v3576_v4 = vcombine.low %v4747_v31, %v4747_v31  ;;  %v2123_v21 = vrot.slane %v2109_v12, %v4206_v49 }
 0x121   : > { %v759_v18 = vpop.permute.xlu1 %758  ;;  %v724_v38 = vpop.permute.xlu0 %723  ;;  %v5370_v12 = vcombine.low %v4441_v9, %v4447_v13 }
 0x122   : > { %v795_v61 = vsel %vm492_vm10, %v793_v25, %v759_v18  ;;  %v780_v28 = vsel %vm492_vm10, %v778_v50, %v724_v38  ;;  %v2055_v1 = vrot.slane %v2041_v17, %v4206_v49  ;;  %v2143_v25 = vcombine.high %v4670_v10, %v4678_v47 }
 0x123   : > { %2208 = vrot.lane.b32.xlu1 %v3676_v33, %s3747_s25  ;;  %2173 = vrot.lane.b32.xlu0 %v3672_v40, %s3747_s25  ;;  %v797_v22 = vsel %vm495_vm11, %v795_v61, %v764_v26  ;;  %v782_v43 = vsel %vm495_vm11, %v780_v28, %v729_v42  ;;  %v5369_v26 = vcombine.low %v4359_v34, %v4365_v59  ;;  %v3724_v42 = vld [vmem:[%s5306_s1 + $0x8] sm:$0xff]   ;;  %v5371_v47 = vmov 0  }
 0x124   : > { %v4784_v60 = vrot.slane %v5370_v12, %v4206_v49  ;;  %v3565_v38 = vcombine.low %v2123_v21, %v2123_v21  ;;  %v2075_v33 = vcombine.high %v4673_v44, %v4683_v19  ;;  %v3558_v40 = vcombine.low %v2055_v1, %v2055_v1 }
 0x125   : > { %v769_v37 = vpop.permute.xlu1 %768  ;;  %v734_v5 = vpop.permute.xlu0 %733  ;;  %v4774_v7 = vrot.slane %v5369_v26, %v4206_v49  ;;  %v4807_v44 = vrot.slane %v2143_v25, %v4206_v49  ;;  %v2705_v12 = vshrl.u32 %v4488_v63, 16 }
 0x126   : > { %v799_v53 = vsel %vm498_vm12, %v797_v22, %v769_v37  ;;  %v784_v29 = vsel %vm498_vm12, %v782_v43, %v734_v5  ;;  %v3679_v10 = vcombine.high %v4784_v60, %v4784_v60  ;;  %v4810_v19 = vrot.slane %v2075_v33, %v4206_v49 }
 0x127   : > { %2552 = vrot.lane.b32.xlu1 %v3583_v15, %s3745_s23  ;;  %3499 = vmatprep.subr.msk.bf16.mxu0 %vm809_vm13, %v799_v53  ;;  %v810_v27 = vsel %vm809_vm13, %v784_v29, 0  ;;  %v3683_v17 = vcombine.high %v4774_v7, %v4774_v7  ;;  %v3566_v37 = vcombine.low %v4807_v44, %v4807_v44  ;;  %v3684_v22 = vcombine.high %v4739_v41, %v4739_v41 }
 0x128   : > { %2517 = vrot.lane.b32.xlu0 %v3576_v4, %s3745_s23  ;;  %829 = vmatpush1.bf16.msra.mxu0 %v810_v27  ;;  %v3559_v5 = vcombine.low %v4810_v19, %v4810_v19  ;;  %v3680_v43 = vcombine.high %v4747_v31, %v4747_v31  ;;  %v5372_v27 = vcombine.high %v4359_v34, %v4365_v59  ;;  %v2692_v34 = vshrl.u32 %v4479_v3, 16 }
 0x129   : > { %v4788_v18 = vpop.permute.xlu1 %1126  ;;  %v4790_v50 = vpop.permute.xlu0 %1091  ;;  %v5373_v41 = vcombine.high %v4441_v9, %v4447_v13  ;;  %v3677_v33 = vcombine.high %v2123_v21, %v2123_v21  ;;  %v2693_v59 = vshrl.u32 %v4490_v14, 16 }
 0x12a   : > { %v4833_v26 = vrot.slane %v5372_v27, %v4206_v49 }
 0x12b   : > { %2213 = vrot.lane.b32.xlu1 %v3565_v38, %s3748_s26  ;;  %3500 = vmatmul.mubr.msk.bf16.vlgmr.msra.gmra.mxu0 %vm805_vm14, %v3724_v42  ;;  %v2704_v42 = vshrl.u32 %v4477_v45, 16  ;;  %v4842_v31 = vrot.slane %v5373_v41, %v4206_v49  ;;  %v5376_v41 = vcombine.high %v4329_v56, %v4337_v46 }
 0x12c   : > { %2178 = vrot.lane.b32.xlu0 %v3558_v40, %s3748_s26  ;;  %1232 = vmatprep.mubr.bf16.mxu0 %v5371_v47  ;;  %v3673_v40 = vcombine.high %v2055_v1, %v2055_v1  ;;  %v3586_v9 = vcombine.low %v4833_v26, %v4833_v26 }
 0x12d   : > { %v4802_v61 = vpop.permute.xlu1 %462  ;;  %v4804_v28 = vpop.permute.xlu0 %427  ;;  %v2706_v13 = vpack.i.b16 %v2705_v12, %v2704_v42  ;;  %v2709_v42 = vpack.i.b16 %v4547_v62, %v4513_v8 }
 0x12f   : > { %2557 = vrot.lane.b32.xlu1 %v3683_v17, %s3746_s24  ;;  %v2703_v17 = vpack.i.b16 %v4488_v63, %v4477_v45  ;;  %v3579_v45 = vcombine.low %v4842_v31, %v4842_v31  ;;  %v2698_v63 = vshrl.u32 %v4515_v11, 16  ;;  %v4899_v56 = vrot.slane %v2706_v13, %v4045_v35 }
 0x130   : > { %2522 = vrot.lane.b32.xlu0 %v3679_v10, %s3746_s24  ;;  %v2691_v10 = vpack.i.b16 %v4490_v14, %v4479_v3  ;;  %v2710_v3 = vshrl.u32 %v4513_v8, 16  ;;  %v2711_v14 = vshrl.u32 %v4547_v62, 16  ;;  %v2697_v8 = vpack.i.b16 %v4549_v39, %v4515_v11 }
 0x131   : > { %v4814_v15 = vpop.permute.xlu1 %1131  ;;  %v4816_v4 = vpop.permute.xlu0 %1096  ;;  %v5377_v62 = vcombine.high %v4333_v30, %v4341_v48  ;;  %v3678_v11 = vcombine.high %v4807_v44, %v4807_v44 }
 0x132   : > { %v2712_v46 = vpack.i.b16 %v2711_v14, %v2710_v3 }
 0x133   : > { %2218 = vrot.lane.b32.xlu1 %v3566_v37, %s3750_s28  ;;  %v5374_v37 = vld [vmem:[#allocation5_spill] sm:$0xff] }
 0x134   : > { %2183 = vrot.lane.b32.xlu0 %v3559_v5, %s3750_s28  ;;  %v503_v21 = vsel %vm479_vm6, %v5374_v37, %v4629_v23  ;;  %v5375_v5 = vld [vmem:[#allocation6_spill] sm:$0xff]  ;;  %v2694_v23 = vpack.i.b16 %v2693_v59, %v2692_v34  ;;  %v4887_v34 = vrot.slane %v2691_v10, %v4045_v35  ;;  %v3674_v10 = vcombine.high %v4810_v19, %v4810_v19 }
 0x135   : > { %v468_v53 = vpop.permute.xlu1 %467  ;;  %v433_v29 = vpop.permute.xlu0 %432  ;;  %v482_v1 = vsel %vm479_vm6, %v5375_v5, %v4631_v58  ;;  %v505_v58 = vsel %vm483_vm7, %v503_v21, %v4643_v2  ;;  %v4896_v2 = vrot.slane %v5377_v62, %v4206_v49  ;;  %v4927_v37 = vrot.slane %v2697_v8, %v4045_v35 }
 0x136   : > { %v485_v12 = vsel %vm483_vm7, %v482_v1, %v4645_v16  ;;  %v507_v30 = vsel %vm486_vm8, %v505_v58, %v4658_v6  ;;  %v4935_v21 = vrot.slane %v2712_v46, %v4045_v35  ;;  %v3681_v58 = vcombine.high %v4842_v31, %v4842_v31 }
 0x137   : > { %2562 = vrot.lane.b32.xlu1 %v3684_v22, %s3747_s25  ;;  %v2699_v22 = vshrl.u32 %v4549_v39, 16  ;;  %v4908_v39 = vrot.slane %v2694_v23, %v4045_v35  ;;  %v488_v48 = vsel %vm486_vm8, %v485_v12, %v4660_v54  ;;  %v509_v13 = vsel %vm489_vm9, %v507_v30, %v4802_v61  ;;  %v5378_v30 = vld [vmem:[#allocation13_spill] sm:$0xff] }
 0x138   : > { %2527 = vrot.lane.b32.xlu0 %v3680_v43, %s3747_s25  ;;  %v491_v44 = vsel %vm489_vm9, %v488_v48, %v4804_v28  ;;  %v511_v54 = vsel %vm492_vm10, %v509_v13, %v468_v53  ;;  %v3580_v61 = vcombine.low %v4896_v2, %v4896_v2  ;;  %v3039_v53 = vshrl.u32 %v4569_v0, 16 }
 0x139   : > { %v4844_v25 = vpop.permute.xlu1 %1136  ;;  %v4846_v38 = vpop.permute.xlu0 %1101  ;;  %v2700_v16 = vpack.i.b16 %v2699_v22, %v2698_v63  ;;  %v494_v19 = vsel %vm492_vm10, %v491_v44, %v433_v29  ;;  %v3027_v29 = vshrl.u32 %v4571_v36, 16  ;;  %v3040_v22 = vshrl.u32 %v4591_v52, 16 }
 0x13a   : > { %v3028_v23 = vshrl.u32 %v4593_v24, 16  ;;  %v3045_v8 = vshrl.u32 %v4603_v20, 16  ;;  %v3033_v31 = vshrl.u32 %v4605_v57, 16  ;;  %v3034_v48 = vshrl.u32 %v5378_v30, 16 }
 0x13b   : > { %2223 = vrot.lane.b32.xlu1 %v3677_v33, %s3749_s27  ;;  %v4881_v33 = vrot.slane %v5376_v41, %v4206_v49  ;;  %v4938_v28 = vrot.slane %v2700_v16, %v4045_v35  ;;  %v2831_v41 = vcombine.low %v4899_v56, %v4935_v21  ;;  %v2729_v16 = vcombine.low %v4887_v34, %v4927_v37 }
 0x13c   : > { %2188 = vrot.lane.b32.xlu0 %v3673_v40, %s3749_s27  ;;  %v4884_v40 = vrot.slane %v2703_v17, %v4045_v35  ;;  %v3029_v13 = vpack.i.b16 %v3028_v23, %v3027_v29  ;;  %v3035_v29 = vpack.i.b16 %v3034_v48, %v3033_v31  ;;  %v3044_v31 = vpack.i.b16 %v4623_v32, %v4603_v20 }
 0x13d   : > { %v473_v43 = vpop.permute.xlu1 %472  ;;  %v438_v27 = vpop.permute.xlu0 %437  ;;  %v3587_v6 = vcombine.low %v4881_v33, %v4881_v33  ;;  %v3686_v44 = vcombine.high %v4881_v33, %v4881_v33 }
 0x13e   : > { %v513_v5 = vsel %vm495_vm11, %v511_v54, %v473_v43  ;;  %v497_v1 = vsel %vm495_vm11, %v494_v19, %v438_v27  ;;  %v3685_v27 = vcombine.high %v4833_v26, %v4833_v26  ;;  %v3046_v26 = vshrl.u32 %v4623_v32, 16  ;;  %v5380_v19 = vld [vmem:[#allocation10_spill] sm:$0xff] }
 0x13f   : > { %2567 = vrot.lane.b32.xlu1 %v3586_v9, %s3748_s26  ;;  %v4917_v9 = vrot.slane %v2709_v42, %v4045_v35  ;;  %v3725_v42 = vld [vmem:[%s5306_s1] sm:$0xff]   ;;  %v2730_v32 = vcombine.high %v4887_v34, %v4927_v37 }
 0x140   : > { %2532 = vrot.lane.b32.xlu0 %v3579_v45, %s3748_s26 }
 0x141   : > { %v4901_v59 = vpop.permute.xlu1 %1141  ;;  %v4903_v17 = vpop.permute.xlu0 %1106  ;;  %v2797_v12 = vcombine.low %v4884_v40, %v4917_v9  ;;  %v2798_v20 = vcombine.high %v4884_v40, %v4917_v9 }
 0x143   : > { %2228 = vrot.lane.b32.xlu1 %v3678_v11, %s3751_s29  ;;  %v2763_v11 = vcombine.low %v4908_v39, %v4938_v28  ;;  %v5010_v23 = vrot.slane %v2797_v12, %v4206_v49 }
 0x144   : > { %2193 = vrot.lane.b32.xlu0 %v3674_v10, %s3751_s29  ;;  %v3041_v10 = vpack.i.b16 %v3040_v22, %v3039_v53  ;;  %v2839_v53 = vrot.slane %v2831_v41, %v4206_v49 }
 0x145   : > { %v478_v45 = vpop.permute.xlu1 %477  ;;  %v443_v3 = vpop.permute.xlu0 %442 }
 0x146   : > { %v515_v63 = vsel %vm498_vm12, %v513_v5, %v478_v45  ;;  %v500_v14 = vsel %vm498_vm12, %v497_v1, %v443_v3  ;;  %v3682_v5 = vcombine.high %v4896_v2, %v4896_v2  ;;  %v3047_v1 = vpack.i.b16 %v3046_v26, %v3045_v8 }
 0x147   : > { %2572 = vrot.lane.b32.xlu1 %v3587_v6, %s3750_s28  ;;  %3502 = vmatprep.subr.msk.bf16.mxu1 %vm809_vm13, %v515_v63  ;;  %v865_v43 = vsel %vm809_vm13, %v500_v14, 0  ;;  %v5379_v6 = vld [vmem:[#allocation9_spill] sm:$0xff]  ;;  %v2771_v63 = vrot.slane %v2763_v11, %v4206_v49  ;;  %v4996_v14 = vrot.slane %v3041_v10, %v4045_v35  ;;  %v3600_v41 = vcombine.low %v2839_v53, %v2839_v53 }
 0x148   : > { %2537 = vrot.lane.b32.xlu0 %v3580_v61, %s3750_s28  ;;  %884 = vmatpush1.bf16.msra.mxu1 %v865_v43  ;;  %v1175_v54 = vsel %vm479_vm6, %v5379_v6, %v4788_v18  ;;  %v1160_v61 = vsel %vm479_vm6, %v5380_v19, %v4790_v50  ;;  %v5013_v43 = vrot.slane %v2729_v16, %v4206_v49  ;;  %v3726_v16 = vld [vmem:[%s5306_s1 + $0x10] sm:$0xff]  }
 0x149   : > { %v1147_v62 = vpop.permute.xlu1 %1146  ;;  %v1112_v46 = vpop.permute.xlu0 %1111  ;;  %v1177_v33 = vsel %vm483_vm7, %v1175_v54, %v4814_v15  ;;  %v1162_v45 = vsel %vm483_vm7, %v1160_v61, %v4816_v4  ;;  %v4999_v15 = vrot.slane %v3029_v13, %v4045_v35  ;;  %v5021_v8 = vrot.slane %v3035_v29, %v4045_v35 }
 0x14a   : > { %v1179_v50 = vsel %vm486_vm8, %v1177_v33, %v4844_v25  ;;  %v1164_v2 = vsel %vm486_vm8, %v1162_v45, %v4846_v38  ;;  %v3038_v11 = vpack.i.b16 %v4591_v52, %v4569_v0  ;;  %v3026_v6 = vpack.i.b16 %v4593_v24, %v4571_v36 }
 0x14b   : > { %2577 = vrot.lane.b32.xlu1 %v3685_v27, %s3749_s27  ;;  %3503 = vmatmul.mubr.msk.bf16.vlgmr.msra.gmra.mxu1 %vm805_vm14, %v3725_v42  ;;  %v1181_v4 = vsel %vm489_vm9, %v1179_v50, %v4901_v59  ;;  %v1166_v22 = vsel %vm489_vm9, %v1164_v2, %v4903_v17  ;;  %v5016_v27 = vrot.slane %v3047_v1, %v4045_v35 }
 0x14c   : > { %2542 = vrot.lane.b32.xlu0 %v3681_v58, %s3749_s27  ;;  %1634 = vmatprep.mubr.bf16.mxu1 %v5371_v47  ;;  %v1183_v25 = vsel %vm492_vm10, %v1181_v4, %v1147_v62  ;;  %v1168_v38 = vsel %vm492_vm10, %v1166_v22, %v1112_v46  ;;  %v3593_v62 = vcombine.low %v2771_v63, %v2771_v63 }
 0x14d   : > { %v1152_v3 = vpop.permute.xlu1 %1151  ;;  %v1117_v18 = vpop.permute.xlu0 %1116  ;;  %v3166_v48 = vcombine.low %v4996_v14, %v5016_v27  ;;  %v3032_v54 = vpack.i.b16 %v5378_v30, %v4605_v57  ;;  %v3098_v0 = vcombine.low %v4999_v15, %v5021_v8  ;;  %v3687_v52 = vcombine.high %v5013_v43, %v5013_v43 }
 0x14e   : > { %v1185_v59 = vsel %vm495_vm11, %v1183_v25, %v1152_v3  ;;  %v1170_v17 = vsel %vm495_vm11, %v1168_v38, %v1117_v18  ;;  %v3123_v36 = vrot.slane %v3038_v11, %v4045_v35  ;;  %v3131_v24 = vrot.slane %v3044_v31, %v4045_v35 }
 0x14f   : > { %2582 = vrot.lane.b32.xlu1 %v3686_v44, %s3751_s29  ;;  %v3691_v44 = vcombine.high %v5010_v23, %v5010_v23  ;;  %v3692_v19 = vcombine.high %v2839_v53, %v2839_v53  ;;  %v3174_v61 = vrot.slane %v3166_v48, %v4206_v49  ;;  %v3055_v40 = vrot.slane %v3026_v6, %v4045_v35 }
 0x150   : > { %2547 = vrot.lane.b32.xlu0 %v3682_v5, %s3751_s29  ;;  %v3063_v9 = vrot.slane %v3032_v54, %v4045_v35  ;;  %v3688_v34 = vcombine.high %v2771_v63, %v2771_v63  ;;  %v3106_v37 = vrot.slane %v3098_v0, %v4206_v49  ;;  %v3132_v5 = vcombine.low %v3123_v36, %v3131_v24 }
 0x151   : > { %v1157_v42 = vpop.permute.xlu1 %1156  ;;  %v1122_v58 = vpop.permute.xlu0 %1121  ;;  %v3617_v45 = vcombine.low %v3174_v61, %v3174_v61  ;;  %v2812_v3 = vrot.slane %v2798_v20, %v4206_v49  ;;  %v2744_v29 = vrot.slane %v2730_v32, %v4206_v49  ;;  %v2832_v35 = vcombine.high %v4899_v56, %v4935_v21 }
 0x152   : > { %v1187_v26 = vsel %vm498_vm12, %v1185_v59, %v1157_v42  ;;  %v1172_v12 = vsel %vm498_vm12, %v1170_v17, %v1122_v58  ;;  %v3064_v18 = vcombine.low %v3055_v40, %v3063_v9  ;;  %v3610_v53 = vcombine.low %v3106_v37, %v3106_v37 }
 0x153   : > { %v1196_v46 = vsel %vm809_vm13, %v1172_v12, 0  ;;  %2887 = vrot.lane.b32.xlu1 %v3600_v41, %s3745_s23  ;;  %3519 = vmatprep.subr.msk.bf16.mxu0 %vm809_vm13, %v1187_v26  ;;  %v3603_v63 = vcombine.low %v2812_v3, %v2812_v3  ;;  %v5087_v4 = vrot.slane %v3132_v5, %v4206_v49  ;;  %v2764_v22 = vcombine.high %v4908_v39, %v4938_v28 }
 0x154   : > { %2852 = vrot.lane.b32.xlu0 %v3593_v62, %s3745_s23  ;;  %1215 = vmatpush1.bf16.msra.mxu0 %v1196_v46  ;;  %v3596_v25 = vcombine.low %v2744_v29, %v2744_v29  ;;  %v5092_v38 = vrot.slane %v3064_v18, %v4206_v49  ;;  %v2846_v17 = vrot.slane %v2832_v35, %v4206_v49 }
 0x155   : > { %v5038_v10 = vpop.permute.xlu1 %1528  ;;  %v5040_v13 = vpop.permute.xlu0 %1493  ;;  %v3699_v59 = vcombine.high %v5087_v4, %v5087_v4  ;;  %v2778_v39 = vrot.slane %v2764_v22, %v4206_v49  ;;  %v3133_v12 = vcombine.high %v3123_v36, %v3131_v24  ;;  %v3065_v11 = vcombine.high %v3055_v40, %v3063_v9  ;;  %v5381_v40 = vld [vmem:[#allocation11_spill] sm:$0xff] }
 0x156   : > { %v3695_v42 = vcombine.high %v5092_v38, %v5092_v38  ;;  %v3604_v41 = vcombine.low %v2846_v17, %v2846_v17  ;;  %v3696_v31 = vcombine.high %v3106_v37, %v3106_v37  ;;  %v3693_v6 = vcombine.high %v2812_v3, %v2812_v3 }
 0x157   : > { %2892 = vrot.lane.b32.xlu1 %v3691_v44, %s3746_s24  ;;  %3520 = vmatmul.mubr.msk.bf16.vlgmr.msra.gmra.mxu0 %vm805_vm14, %v3726_v16  ;;  %v3597_v26 = vcombine.low %v2778_v39, %v2778_v39  ;;  %v3700_v16 = vcombine.high %v3174_v61, %v3174_v61  ;;  %v3147_v54 = vrot.slane %v3133_v12, %v4206_v49 }
 0x158   : > { %2857 = vrot.lane.b32.xlu0 %v3687_v52, %s3746_s24  ;;  %1969 = vmatprep.mubr.bf16.mxu0 %v5371_v47  ;;  %v3689_v0 = vcombine.high %v2744_v29, %v2744_v29  ;;  %v3079_v52 = vrot.slane %v3065_v11, %v4206_v49  ;;  %v3167_v20 = vcombine.high %v4996_v14, %v5016_v27 }
 0x159   : > { %v5062_v57 = vpop.permute.xlu1 %1533  ;;  %v5064_v30 = vpop.permute.xlu0 %1498  ;;  %v3620_v24 = vcombine.low %v3147_v54, %v3147_v54  ;;  %v1577_v9 = vsel %vm479_vm6, %v5381_v40, %v5038_v10  ;;  %v3694_v5 = vcombine.high %v2846_v17, %v2846_v17  ;;  %v3728_v40 = vld [vmem:[%s5306_s1 + $0x20] sm:$0xff]  }
 0x15a   : > { %v3613_v61 = vcombine.low %v3079_v52, %v3079_v52  ;;  %v1579_v14 = vsel %vm483_vm7, %v1577_v9, %v5062_v57 }
 0x15b   : > { %2897 = vrot.lane.b32.xlu1 %v3692_v19, %s3747_s25  ;;  %v3099_v19 = vcombine.high %v4999_v15, %v5021_v8 }
 0x15c   : > { %2862 = vrot.lane.b32.xlu0 %v3688_v34, %s3747_s25  ;;  %v5382_v34 = vld [vmem:[#allocation3_spill] sm:$0xff] }
 0x15d   : > { %v5072_v1 = vpop.permute.xlu1 %1538  ;;  %v5074_v33 = vpop.permute.xlu0 %1503  ;;  %v1562_v37 = vsel %vm479_vm6, %v5382_v34, %v5040_v13  ;;  %v3690_v13 = vcombine.high %v2778_v39, %v2778_v39  ;;  %v3113_v18 = vrot.slane %v3099_v19, %v4206_v49  ;;  %v3701_v39 = vcombine.high %v3147_v54, %v3147_v54 }
 0x15e   : > { %v1564_v27 = vsel %vm483_vm7, %v1562_v37, %v5064_v30  ;;  %v1581_v10 = vsel %vm486_vm8, %v1579_v14, %v5072_v1 }
 0x15f   : > { %3222 = vrot.lane.b32.xlu1 %v3617_v45, %s3745_s23  ;;  %v3181_v45 = vrot.slane %v3167_v20, %v4206_v49  ;;  %v1566_v3 = vsel %vm486_vm8, %v1564_v27, %v5074_v33 }
 0x160   : > { %3187 = vrot.lane.b32.xlu0 %v3610_v53, %s3745_s23 }
 0x161   : > { %v5082_v50 = vpop.permute.xlu1 %1863  ;;  %v5084_v2 = vpop.permute.xlu0 %1828  ;;  %v3621_v22 = vcombine.low %v3181_v45, %v3181_v45  ;;  %v3702_v54 = vcombine.high %v3181_v45, %v3181_v45 }
 0x163   : > { %2902 = vrot.lane.b32.xlu1 %v3603_v63, %s3748_s26 }
 0x164   : > { %2867 = vrot.lane.b32.xlu0 %v3596_v25, %s3748_s26 }
 0x165   : > { %v1544_v56 = vpop.permute.xlu1 %1543  ;;  %v1509_v21 = vpop.permute.xlu0 %1508 }
 0x166   : > { %v1583_v53 = vsel %vm489_vm9, %v1581_v10, %v1544_v56  ;;  %v1568_v57 = vsel %vm489_vm9, %v1566_v3, %v1509_v21  ;;  %v3614_v56 = vcombine.low %v3113_v18, %v3113_v18 }
 0x167   : > { %3227 = vrot.lane.b32.xlu1 %v3699_v59, %s3746_s24  ;;  %v3727_v59 = vld [vmem:[%s5306_s1 + $0x18] sm:$0xff]  }
 0x168   : > { %3192 = vrot.lane.b32.xlu0 %v3695_v42, %s3746_s24  ;;  %s3629_s24 = sshll.u32 %s5387_s16, 2 }
 0x169   : > { %v5104_v28 = vpop.permute.xlu1 %1868  ;;  %v5106_v58 = vpop.permute.xlu0 %1833 }
 0x16b   : > { %2907 = vrot.lane.b32.xlu1 %v3604_v41, %s3750_s28  ;;  %v3697_v41 = vcombine.high %v3079_v52, %v3079_v52 }
 0x16c   : > { %2872 = vrot.lane.b32.xlu0 %v3597_v26, %s3750_s28  ;;  %v5383_v26 = vld [vmem:[#allocation4_spill] sm:$0xff] }
 0x16d   : > { %v1549_v62 = vpop.permute.xlu1 %1548  ;;  %v1514_v46 = vpop.permute.xlu0 %1513  ;;  %v1912_v12 = vsel %vm479_vm6, %v5383_v26, %v5082_v50 }
 0x16e   : > { %v1585_v30 = vsel %vm492_vm10, %v1583_v53, %v1549_v62  ;;  %v1570_v29 = vsel %vm492_vm10, %v1568_v57, %v1514_v46  ;;  %v5384_v62 = vld [vmem:[#allocation12_spill] sm:$0xff] }
 0x16f   : > { %3232 = vrot.lane.b32.xlu1 %v3700_v16, %s3747_s25  ;;  %v1897_v46 = vsel %vm479_vm6, %v5384_v62, %v5084_v2  ;;  %v1914_v16 = vsel %vm483_vm7, %v1912_v12, %v5104_v28  ;;  %v3698_v2 = vcombine.high %v3113_v18, %v3113_v18 }
 0x170   : > { %3197 = vrot.lane.b32.xlu0 %v3696_v31, %s3747_s25  ;;  %v1899_v11 = vsel %vm483_vm7, %v1897_v46, %v5106_v58 }
 0x171   : > { %v5112_v48 = vpop.permute.xlu1 %1873  ;;  %v5114_v44 = vpop.permute.xlu0 %1838 }
 0x172   : > { %v1916_v50 = vsel %vm486_vm8, %v1914_v16, %v5112_v48  ;;  %v3729_v16 = vld [vmem:[%s5306_s1 + $0x28] sm:$0xff]  }
 0x173   : > { %2912 = vrot.lane.b32.xlu1 %v3693_v6, %s3749_s27 }
 0x174   : > { %2877 = vrot.lane.b32.xlu0 %v3689_v0, %s3749_s27  ;;  %v1901_v0 = vsel %vm486_vm8, %v1899_v11, %v5114_v44 }
 0x175   : > { %v1554_v32 = vpop.permute.xlu1 %1553  ;;  %v1519_v36 = vpop.permute.xlu0 %1518 }
 0x176   : > { %v1587_v1 = vsel %vm495_vm11, %v1585_v30, %v1554_v32  ;;  %v1572_v35 = vsel %vm495_vm11, %v1570_v29, %v1519_v36 }
 0x177   : > { %3237 = vrot.lane.b32.xlu1 %v3620_v24, %s3748_s26 }
 0x178   : > { %3202 = vrot.lane.b32.xlu0 %v3613_v61, %s3748_s26 }
 0x179   : > { %v1879_v15 = vpop.permute.xlu1 %1878  ;;  %v1844_v8 = vpop.permute.xlu0 %1843 }
 0x17a   : > { %v1918_v52 = vsel %vm489_vm9, %v1916_v50, %v1879_v15  ;;  %v1903_v20 = vsel %vm489_vm9, %v1901_v0, %v1844_v8 }
 0x17b   : > { %2917 = vrot.lane.b32.xlu1 %v3694_v5, %s3751_s29 }
 0x17c   : > { %2882 = vrot.lane.b32.xlu0 %v3690_v13, %s3751_s29 }
 0x17d   : > { %v1559_v33 = vpop.permute.xlu1 %1558  ;;  %v1524_v63 = vpop.permute.xlu0 %1523 }
 0x17e   : > { %v1589_v49 = vsel %vm498_vm12, %v1587_v1, %v1559_v33  ;;  %v1574_v25 = vsel %vm498_vm12, %v1572_v35, %v1524_v63 }
 0x17f   : > { %v1598_v21 = vsel %vm809_vm13, %v1574_v25, 0  ;;  %3242 = vrot.lane.b32.xlu1 %v3621_v22, %s3750_s28  ;;  %3536 = vmatprep.subr.msk.bf16.mxu1 %vm809_vm13, %v1589_v49 }
 0x180   : > { %3207 = vrot.lane.b32.xlu0 %v3614_v56, %s3750_s28  ;;  %1617 = vmatpush1.bf16.msra.mxu1 %v1598_v21 }
 0x181   : > { %v1884_v17 = vpop.permute.xlu1 %1883  ;;  %v1849_v42 = vpop.permute.xlu0 %1848 }
 0x182   : > { %v1920_v28 = vsel %vm492_vm10, %v1918_v52, %v1884_v17  ;;  %v1905_v58 = vsel %vm492_vm10, %v1903_v20, %v1849_v42 }
 0x183   : > { %3247 = vrot.lane.b32.xlu1 %v3701_v39, %s3749_s27  ;;  %3537 = vmatmul.mubr.msk.bf16.vlgmr.msra.gmra.mxu1 %vm805_vm14, %v3727_v59 }
 0x184   : > { %3212 = vrot.lane.b32.xlu0 %v3697_v41, %s3749_s27  ;;  %2304 = vmatprep.mubr.bf16.mxu1 %v5371_v47  ;;  %s212_s27 = scalar_lea.vmem %s5307_s2, %s3629_s24 }
 0x185   : > { %v1889_v31 = vpop.permute.xlu1 %1888  ;;  %v1854_v6 = vpop.permute.xlu0 %1853 }
 0x186   : > { %v1922_v32 = vsel %vm495_vm11, %v1920_v28, %v1889_v31  ;;  %v1907_v48 = vsel %vm495_vm11, %v1905_v58, %v1854_v6 }
 0x187   : > { %3252 = vrot.lane.b32.xlu1 %v3702_v54, %s3751_s29 }
 0x188   : > { %3217 = vrot.lane.b32.xlu0 %v3698_v2, %s3751_s29 }
 0x189   : > { %v1894_v36 = vpop.permute.xlu1 %1893  ;;  %v1859_v24 = vpop.permute.xlu0 %1858 }
 0x18a   : > { %v1924_v44 = vsel %vm498_vm12, %v1922_v32, %v1894_v36  ;;  %v1909_v19 = vsel %vm498_vm12, %v1907_v48, %v1859_v24 }
 0x18b   : > { %v1933_v61 = vsel %vm809_vm13, %v1909_v19, 0  ;;  %3553 = vmatprep.subr.msk.bf16.mxu0 %vm809_vm13, %v1924_v44 }
 0x18c   : > { %1952 = vmatpush1.bf16.msra.mxu0 %v1933_v61 }
 0x18d   : > { %v2199_v9 = vpop.permute.xlu1 %2198  ;;  %v2164_v34 = vpop.permute.xlu0 %2163 }
 0x18e   : > { %v2247_v35 = vsel %vm479_vm6, %v4714_v55, %v2199_v9  ;;  %v2232_v33 = vsel %vm479_vm6, %v4717_v51, %v2164_v34  ;;  %v3730_v9 = vld [vmem:[%s5306_s1 + $0x30] sm:$0xff]  }
 0x18f   : > { %3554 = vmatmul.mubr.msk.bf16.vlgmr.msra.gmra.mxu0 %vm805_vm14, %v3728_v40 }
 0x190   : > { %2658 = vmatprep.mubr.bf16.mxu0 %v5371_v47 }
 0x191   : > { %v2204_v37 = vpop.permute.xlu1 %2203  ;;  %v2169_v14 = vpop.permute.xlu0 %2168 }
 0x192   : > { %v2249_v63 = vsel %vm483_vm7, %v2247_v35, %v2204_v37  ;;  %v2234_v49 = vsel %vm483_vm7, %v2232_v33, %v2169_v14 }
 0x195   : > { %v2209_v27 = vpop.permute.xlu1 %2208  ;;  %v2174_v15 = vpop.permute.xlu0 %2173 }
 0x196   : > { %v2251_v25 = vsel %vm486_vm8, %v2249_v63, %v2209_v27  ;;  %v2236_v21 = vsel %vm486_vm8, %v2234_v49, %v2174_v15 }
 0x199   : > { %v2553_v8 = vpop.permute.xlu1 %2552 }
 0x19a   : > { %v2518_v5 = vpop.permute.xlu0 %2517  ;;  %v2601_v6 = vsel %vm479_vm6, %v4774_v7, %v2553_v8 }
 0x19b   : > { %v2586_v54 = vsel %vm479_vm6, %v4784_v60, %v2518_v5 }
 0x19d   : > { %v2214_v45 = vpop.permute.xlu1 %2213 }
 0x19e   : > { %v2179_v10 = vpop.permute.xlu0 %2178  ;;  %v2253_v59 = vsel %vm489_vm9, %v2251_v25, %v2214_v45 }
 0x19f   : > { %v2238_v17 = vsel %vm489_vm9, %v2236_v21, %v2179_v10 }
 0x1a1   : > { %v2558_v3 = vpop.permute.xlu1 %2557 }
 0x1a2   : > { %v2523_v13 = vpop.permute.xlu0 %2522  ;;  %v2603_v50 = vsel %vm483_vm7, %v2601_v6, %v2558_v3 }
 0x1a3   : > { %v2588_v2 = vsel %vm483_vm7, %v2586_v54, %v2523_v13 }
 0x1a5   : > { %v2219_v18 = vpop.permute.xlu1 %2218 }
 0x1a6   : > { %v2184_v53 = vpop.permute.xlu0 %2183  ;;  %v2255_v42 = vsel %vm492_vm10, %v2253_v59, %v2219_v18 }
 0x1a7   : > { %v2240_v55 = vsel %vm492_vm10, %v2238_v17, %v2184_v53 }
 0x1a9   : > { %v2563_v57 = vpop.permute.xlu1 %2562 }
 0x1aa   : > { %v2528_v30 = vpop.permute.xlu0 %2527  ;;  %v2605_v52 = vsel %vm486_vm8, %v2603_v50, %v2563_v57 }
 0x1ab   : > { %v2590_v28 = vsel %vm486_vm8, %v2588_v2, %v2528_v30 }
 0x1ad   : > { %v2224_v29 = vpop.permute.xlu1 %2223 }
 0x1ae   : > { %v2189_v1 = vpop.permute.xlu0 %2188  ;;  %v2257_v51 = vsel %vm495_vm11, %v2255_v42, %v2224_v29 }
 0x1af   : > { %v2242_v41 = vsel %vm495_vm11, %v2240_v55, %v2189_v1 }
 0x1b1   : > { %v2568_v22 = vpop.permute.xlu1 %2567 }
 0x1b2   : > { %v2533_v56 = vpop.permute.xlu0 %2532  ;;  %v2607_v58 = vsel %vm489_vm9, %v2605_v52, %v2568_v22 }
 0x1b3   : > { %v2592_v7 = vsel %vm489_vm9, %v2590_v28, %v2533_v56 }
 0x1b5   : > { %v2229_v39 = vpop.permute.xlu1 %2228 }
 0x1b6   : > { %v2259_v26 = vsel %vm498_vm12, %v2257_v51, %v2229_v39  ;;  %v2194_v12 = vpop.permute.xlu0 %2193 }
 0x1b7   : > { %v2244_v62 = vsel %vm498_vm12, %v2242_v41, %v2194_v12  ;;  %3570 = vmatprep.subr.msk.bf16.mxu1 %vm809_vm13, %v2259_v26 }
 0x1b8   : > { %v2268_v46 = vsel %vm809_vm13, %v2244_v62, 0  ;;  %v3731_v62 = vld [vmem:[%s5306_s1 + $0x38] sm:$0xff]  }
 0x1b9   : > { %2287 = vmatpush1.bf16.msra.mxu1 %v2268_v46  ;;  %v2573_v11 = vpop.permute.xlu1 %2572 }
 0x1ba   : > { %v2538_v31 = vpop.permute.xlu0 %2537  ;;  %v2609_v32 = vsel %vm492_vm10, %v2607_v58, %v2573_v11 }
 0x1bb   : > { %v2594_v60 = vsel %vm492_vm10, %v2592_v7, %v2538_v31 }
 0x1bc   : > { %3571 = vmatmul.mubr.msk.bf16.vlgmr.msra.gmra.mxu1 %vm805_vm14, %v3729_v16 }
 0x1bd   : > { %v2578_v0 = vpop.permute.xlu1 %2577  ;;  %2993 = vmatprep.mubr.bf16.mxu1 %v5371_v47 }
 0x1be   : > { %v2543_v20 = vpop.permute.xlu0 %2542  ;;  %v2611_v48 = vsel %vm495_vm11, %v2609_v32, %v2578_v0 }
 0x1bf   : > { %v2596_v24 = vsel %vm495_vm11, %v2594_v60, %v2543_v20 }
 0x1c1   : > { %v2583_v36 = vpop.permute.xlu1 %2582 }
 0x1c2   : > { %v2613_v44 = vsel %vm498_vm12, %v2611_v48, %v2583_v36  ;;  %v2548_v19 = vpop.permute.xlu0 %2547 }
 0x1c3   : > { %v2598_v61 = vsel %vm498_vm12, %v2596_v24, %v2548_v19  ;;  %3591 = vmatprep.subr.msk.bf16.mxu0 %vm809_vm13, %v2613_v44  ;;  %v3732_v44 = vld [vmem:[%s5306_s1 + $0x40] sm:$0xff]  }
 0x1c4   : > { %v2622_v40 = vsel %vm809_vm13, %v2598_v61, 0 }
 0x1c5   : > { %2641 = vmatpush1.bf16.msra.mxu0 %v2622_v40  ;;  %v2888_v34 = vpop.permute.xlu1 %2887 }
 0x1c6   : > { %v2853_v37 = vpop.permute.xlu0 %2852  ;;  %v2936_v33 = vsel %vm479_vm6, %v5010_v23, %v2888_v34 }
 0x1c8   : > { %3592 = vmatmul.mubr.msk.bf16.vlgmr.msra.gmra.mxu0 %vm805_vm14, %v3730_v9 }
 0x1c9   : > { %v2893_v14 = vpop.permute.xlu1 %2892  ;;  %3328 = vmatprep.mubr.bf16.mxu0 %v5371_v47  ;;  %v2921_v47 = vsel %vm479_vm6, %v5013_v43, %v2853_v37 }
 0x1ca   : > { %v2858_v27 = vpop.permute.xlu0 %2857  ;;  %v2938_v63 = vsel %vm483_vm7, %v2936_v33, %v2893_v14 }
 0x1cb   : > { %v2923_v49 = vsel %vm483_vm7, %v2921_v47, %v2858_v27 }
 0x1cd   : > { %v2898_v15 = vpop.permute.xlu1 %2897 }
 0x1ce   : > { %v2863_v8 = vpop.permute.xlu0 %2862  ;;  %v2940_v25 = vsel %vm486_vm8, %v2938_v63, %v2898_v15 }
 0x1cf   : > { %v2925_v21 = vsel %vm486_vm8, %v2923_v49, %v2863_v8 }
 0x1d1   : > { %v3223_v5 = vpop.permute.xlu1 %3222 }
 0x1d2   : > { %v3188_v45 = vpop.permute.xlu0 %3187  ;;  %v3271_v11 = vsel %vm479_vm6, %v5087_v4, %v3223_v5 }
 0x1d3   : > { %v3256_v31 = vsel %vm479_vm6, %v5092_v38, %v3188_v45 }
 0x1d5   : > { %v2903_v10 = vpop.permute.xlu1 %2902 }
 0x1d6   : > { %v2868_v3 = vpop.permute.xlu0 %2867  ;;  %v2942_v59 = vsel %vm489_vm9, %v2940_v25, %v2903_v10 }
 0x1d7   : > { %v2927_v17 = vsel %vm489_vm9, %v2925_v21, %v2868_v3 }
 0x1d9   : > { %v3228_v13 = vpop.permute.xlu1 %3227 }
 0x1da   : > { %v3193_v18 = vpop.permute.xlu0 %3192  ;;  %v3273_v6 = vsel %vm483_vm7, %v3271_v11, %v3228_v13 }
 0x1db   : > { %v3258_v50 = vsel %vm483_vm7, %v3256_v31, %v3193_v18 }
 0x1dd   : > { %v2908_v53 = vpop.permute.xlu1 %2907 }
 0x1de   : > { %v2873_v57 = vpop.permute.xlu0 %2872  ;;  %v2944_v42 = vsel %vm492_vm10, %v2942_v59, %v2908_v53 }
 0x1df   : > { %v2929_v23 = vsel %vm492_vm10, %v2927_v17, %v2873_v57 }
 0x1e1   : > { %v3233_v30 = vpop.permute.xlu1 %3232 }
 0x1e2   : > { %v3198_v29 = vpop.permute.xlu0 %3197  ;;  %v3275_v0 = vsel %vm486_vm8, %v3273_v6, %v3233_v30 }
 0x1e3   : > { %v3260_v52 = vsel %vm486_vm8, %v3258_v50, %v3198_v29 }
 0x1e5   : > { %v2913_v1 = vpop.permute.xlu1 %2912 }
 0x1e6   : > { %v2878_v35 = vpop.permute.xlu0 %2877  ;;  %v2946_v43 = vsel %vm495_vm11, %v2944_v42, %v2913_v1 }
 0x1e7   : > { %v2931_v51 = vsel %vm495_vm11, %v2929_v23, %v2878_v35 }
 0x1e9   : > { %v3238_v22 = vpop.permute.xlu1 %3237 }
 0x1ea   : > { %v3203_v56 = vpop.permute.xlu0 %3202  ;;  %v3277_v20 = vsel %vm489_vm9, %v3275_v0, %v3238_v22 }
 0x1eb   : > { %v3262_v28 = vsel %vm489_vm9, %v3260_v52, %v3203_v56  ;;  %v848_v19 = vpop.f32.mrf.mxu0 }
 0x1ed   : > { %v2918_v55 = vpop.permute.xlu1 %2917  ;;  %v850_v61 = vpop.f32.mrf.mxu0 }
 0x1ee   : > { %v2948_v39 = vsel %vm498_vm12, %v2946_v43, %v2918_v55  ;;  %v2883_v41 = vpop.permute.xlu0 %2882 }
 0x1ef   : > { %v2933_v26 = vsel %vm498_vm12, %v2931_v51, %v2883_v41  ;;  %3608 = vmatprep.subr.msk.bf16.mxu1 %vm809_vm13, %v2948_v39  ;;  %v852_v9 = vpop.f32.mrf.mxu0 }
 0x1f0   : > { %v2957_v12 = vsel %vm809_vm13, %v2933_v26, 0 }
 0x1f1   : > { %2976 = vmatpush1.bf16.msra.mxu1 %v2957_v12  ;;  %v3243_v46 = vpop.permute.xlu1 %3242  ;;  %v854_v37 = vpop.f32.mrf.mxu0 }
 0x1f2   : > { %v3208_v16 = vpop.permute.xlu0 %3207  ;;  %v3279_v4 = vsel %vm492_vm10, %v3277_v20, %v3243_v46 }
 0x1f3   : > { %v3264_v58 = vsel %vm492_vm10, %v3262_v28, %v3208_v16  ;;  %v3343_v16 = vld [vmem:[%s212_s27] sm:$0xf] }
 0x1f4   : > { %3609 = vmatmul.mubr.msk.bf16.vlgmr.msra.gmra.mxu1 %vm805_vm14, %v3731_v62  ;;  %v5385_v62 = vld [vmem:[#allocation2_spill] sm:$0xff] }
 0x1f5   : > { %v3248_v54 = vpop.permute.xlu1 %3247  ;;  %v3349_v46 = vsub.s32 0, %v5385_v62  ;;  %v3353_v11 = vsub.s32 2, %v5385_v62  ;;  %v3371_v0 = vsub.s32 1, %v5385_v62 }
 0x1f6   : > { %v3213_v2 = vpop.permute.xlu0 %3212  ;;  %v3281_v38 = vsel %vm495_vm11, %v3279_v4, %v3248_v54 }
 0x1f7   : > { %v3266_v32 = vsel %vm495_vm11, %v3264_v58, %v3213_v2  ;;  %v3350_v20 = vrot.slane %v3343_v16, %v3349_v46  ;;  %v3354_v28 = vrot.slane %v3343_v16, %v3353_v11 }
 0x1f9   : > { %v3253_v7 = vpop.permute.xlu1 %3252 }
 0x1fa   : > { %v3283_v60 = vsel %vm498_vm12, %v3281_v38, %v3253_v7  ;;  %v3218_v48 = vpop.permute.xlu0 %3217  ;;  %v3375_v38 = vsub.s32 3, %v5385_v62 }
 0x1fb   : > { %v3268_v36 = vsel %vm498_vm12, %v3266_v32, %v3218_v48  ;;  %3625 = vmatprep.subr.msk.bf16.mxu0 %vm809_vm13, %v3283_v60  ;;  %v3372_v60 = vrot.slane %v3343_v16, %v3371_v0 }
 0x1fc   : > { %v3292_v24 = vsel %vm809_vm13, %v3268_v36, 0 }
 0x1fd   : > { %3311 = vmatpush1.bf16.msra.mxu0 %v3292_v24 }
 0x200   : > { %3626 = vmatmul.mubr.msk.bf16.vlgmr.msra.gmra.mxu0 %vm805_vm14, %v3732_v44  ;;  %v3360_v44 = vrot.slane %v3350_v20, %v3349_v46 }
 0x20b   : > { %v903_v40 = vpop.f32.mrf.mxu1 }
 0x20c   : > { %v904_v29 = vadd.f32 %v903_v40, %v848_v19 }
 0x20d   : > { %v905_v34 = vpop.f32.mrf.mxu1 }
 0x20e   : > { %v906_v35 = vadd.f32 %v905_v34, %v850_v61  ;;  %v3364_v61 = vrot.slane %v3354_v28, %v3349_v46 }
 0x20f   : > { %v907_v14 = vpop.f32.mrf.mxu1 }
 0x210   : > { %v908_v63 = vadd.f32 %v907_v14, %v852_v9 }
 0x211   : > { %v909_v15 = vpop.f32.mrf.mxu1 }
 0x212   : > { %v910_v25 = vadd.f32 %v909_v15, %v854_v37  ;;  %v3376_v37 = vrot.slane %v3343_v16, %v3375_v38  ;;  %v3382_v15 = vrot.slane %v3372_v60, %v3371_v0 }
 0x217   : > { %v1234_v27 = vpop.f32.mrf.mxu0 }
 0x218   : > { %v1243_v47 = vadd.f32 %v1234_v27, %v904_v29  ;;  %v3345_v29 = vld [vmem:[%s5308_s3 + $0x8] sm:$0xff] }
 0x219   : > { %v1236_v8 = vpop.f32.mrf.mxu0 }
 0x21a   : > { %v1244_v49 = vadd.f32 %v1236_v8, %v906_v35 }
 0x21b   : > { %v1238_v45 = vpop.f32.mrf.mxu0 }
 0x21c   : > { %v1245_v21 = vadd.f32 %v1238_v45, %v908_v63 }
 0x21d   : > { %v1240_v3 = vpop.f32.mrf.mxu0 }
 0x21e   : > { %v1246_v42 = vadd.f32 %v1240_v3, %v910_v25  ;;  %v3344_v3 = vld [vmem:[%s5308_s3] sm:$0xff] }
 0x243   : > { %v1636_v5 = vpop.f32.mrf.mxu1 }
 0x244   : > { %v1645_v59 = vadd.f32 %v1636_v5, %v1243_v47 }
 0x245   : > { %v1638_v10 = vpop.f32.mrf.mxu1 }
 0x246   : > { %v1646_v23 = vadd.f32 %v1638_v10, %v1244_v49 }
 0x247   : > { %v1640_v13 = vpop.f32.mrf.mxu1 }
 0x248   : > { %v1647_v51 = vadd.f32 %v1640_v13, %v1245_v21 }
 0x249   : > { %v1642_v53 = vpop.f32.mrf.mxu1 }
 0x24a   : > { %v1648_v12 = vadd.f32 %v1642_v53, %v1246_v42 }
 0x24f   : > { %v1971_v18 = vpop.f32.mrf.mxu0 }
 0x250   : > { %v1980_v55 = vadd.f32 %v1971_v18, %v1645_v59 }
 0x251   : > { %v1973_v57 = vpop.f32.mrf.mxu0 }
 0x252   : > { %v1981_v26 = vadd.f32 %v1973_v57, %v1646_v23 }
 0x253   : > { %v1975_v1 = vpop.f32.mrf.mxu0 }
 0x254   : > { %v1982_v31 = vadd.f32 %v1975_v1, %v1647_v51 }
 0x255   : > { %v1977_v22 = vpop.f32.mrf.mxu0 }
 0x256   : > { %v1983_v2 = vadd.f32 %v1977_v22, %v1648_v12 }
 0x27c   : > { %v2306_v30 = vpop.f32.mrf.mxu1 }
 0x27d   : > { %v2315_v6 = vadd.f32 %v2306_v30, %v1980_v55  ;;  %v3386_v30 = vrot.slane %v3376_v37, %v3371_v0 }
 0x27e   : > { %v2308_v33 = vpop.f32.mrf.mxu1 }
 0x27f   : > { %v2316_v52 = vadd.f32 %v2308_v33, %v1981_v26 }
 0x280   : > { %v2310_v56 = vpop.f32.mrf.mxu1 }
 0x281   : > { %v2317_v58 = vadd.f32 %v2310_v56, %v1982_v31 }
 0x282   : > { %v2312_v43 = vpop.f32.mrf.mxu1 }
 0x283   : > { %v2318_v36 = vadd.f32 %v2312_v43, %v1983_v2 }
 0x288   : > { %v2660_v17 = vpop.f32.mrf.mxu0 }
 0x289   : > { %v2669_v4 = vadd.f32 %v2660_v17, %v2315_v6 }
 0x28a   : > { %v2662_v39 = vpop.f32.mrf.mxu0 }
 0x28b   : > { %v2670_v48 = vadd.f32 %v2662_v39, %v2316_v52 }
 0x28c   : > { %v2664_v54 = vpop.f32.mrf.mxu0 }
 0x28d   : > { %v2671_v40 = vadd.f32 %v2664_v54, %v2317_v58 }
 0x28e   : > { %v2666_v7 = vpop.f32.mrf.mxu0 }
 0x28f   : > { %v2672_v8 = vadd.f32 %v2666_v7, %v2318_v36 }
 0x2b4   : > { %v2995_v41 = vpop.f32.mrf.mxu1 }
 0x2b5   : > { %v3004_v24 = vadd.f32 %v2995_v41, %v2669_v4 }
 0x2b6   : > { %v2997_v50 = vpop.f32.mrf.mxu1 }
 0x2b7   : > { %v3005_v9 = vadd.f32 %v2997_v50, %v2670_v48 }
 0x2b8   : > { %v2999_v32 = vpop.f32.mrf.mxu1 }
 0x2b9   : > { %v3006_v5 = vadd.f32 %v2999_v32, %v2671_v40 }
 0x2ba   : > { %v3001_v14 = vpop.f32.mrf.mxu1 }
 0x2bb   : > { %v3007_v18 = vadd.f32 %v3001_v14, %v2672_v8 }
 0x2c0   : > { %v3330_v19 = vpop.f32.mrf.mxu0 }
 0x2c1   : > { %v3339_v34 = vadd.f32 %v3330_v19, %v3004_v24 }
 0x2c2   : > { %v3332_v27 = vpop.f32.mrf.mxu0 }
 0x2c3   : > { %v3365_v45 = vmul.f32 %v3360_v44, %v3339_v34  ;;  %v3340_v10 = vadd.f32 %v3332_v27, %v3005_v9 }
 0x2c4   : > { %v3334_v13 = vpop.f32.mrf.mxu0 }
 0x2c5   : > { %v3366_v53 = vmul.f32 %v3364_v61, %v3340_v10  ;;  %v3341_v57 = vadd.f32 %v3334_v13, %v3006_v5  ;;  %v3367_v35 = vadd.f32 %v3365_v45, %v3344_v3 }
 0x2c6   : > { %v3336_v1 = vpop.f32.mrf.mxu0 }
 0x2c7   : > { %v3387_v33 = vmul.f32 %v3382_v15, %v3341_v57  ;;  %v3342_v47 = vadd.f32 %v3336_v1, %v3007_v18  ;;  %v3368_v63 = vadd.f32 %v3366_v53, %v3345_v29 }
 0x2c9   : > { %v3389_v22 = vadd.f32 %v3387_v33, %v3367_v35  ;;  %v3388_v49 = vmul.f32 %v3386_v30, %v3342_v47 }
 0x2cb   : > { %3391 = vst [vmem:[%s217_s9] sm:$0xff] %v3389_v22  ;;  %v3390_v25 = vadd.f32 %v3388_v49, %v3368_v63 }
 0x2cd   : > { %3392 = vst [vmem:[%s217_s9 + $0x8] sm:$0xff] %v3390_v25 }
 0x2ce PF: > { %s14_s15 = sadd.s32 1, %s3739_s15  }
 0x2cf   : > { %p11_p4 = scmp.ge.s32.totalorder %s14_s15, 4  }
 0x2d1   :  { %13 = sbr.rel (!%p11_p4) target bundleno = 1 (0x1), region = 69 }

</bundles_post_ra>
